<compile_context>
chip_gen: v6e
topology: v6e:2x2x1
jax: 0.10.0
libtpu: 0.0.40
codegen_flags: <defaults>
</compile_context>

<pallas_src>
import math
from functools import partial

import jax
import jax.numpy as jnp
from jax import lax
from jax.experimental import pallas as pl
from jax.experimental.pallas import tpu as pltpu


_VMEM_LIMIT = 32 * 1024 * 1024   # explicit scoped-VMEM limit (fits all generations)
_LN_EPS = 1e-5                   # torch.nn.LayerNorm default


# ---------------------------------------------------------------------------
# In-kernel helpers (pure jnp, traced inside the Pallas kernels)
# ---------------------------------------------------------------------------
def _erf(x):
    # Numerical-Recipes erfc rational approximation, |rel err| < 1.2e-7.
    # Uses one EUP exp + a short VALU chain; lowers cleanly on TPU.
    a = jnp.abs(x)
    t = 1.0 / (1.0 + 0.5 * a)
    poly = -1.26551223 + t * (1.00002368 + t * (0.37409196 + t * (0.09678418 +
           t * (-0.18628806 + t * (0.27886807 + t * (-1.13520398 + t * (1.48851587 +
           t * (-0.82215223 + t * 0.17087277))))))))
    erfc_abs = t * jnp.exp(-a * a + poly)
    erf_abs = 1.0 - erfc_abs
    return jnp.where(x >= 0, erf_abs, -erf_abs)


def _gelu_exact(x):
    # matches torch.nn.GELU() (erf-based, not tanh-approx)
    return 0.5 * x * (1.0 + _erf(x * (1.0 / math.sqrt(2.0))))


def _layernorm_f32(x, g, b, eps):
    xf = x.astype(jnp.float32)
    mean = jnp.mean(xf, axis=-1, keepdims=True)
    xc = xf - mean
    var = jnp.mean(xc * xc, axis=-1, keepdims=True)
    return xc * lax.rsqrt(var + eps) * g.astype(jnp.float32) + b.astype(jnp.float32)


def _mha(q, k, v, H, scale, dtype):
    """Multi-head attention core.

    q: (Nq, C), k/v: (Nk, C) in `dtype` (native MXU dtype).
    Returns the concatenated (Nq, C) f32 attention output (lane-dense slab).
    """
    C = q.shape[-1]
    Dh = C // H
    outs = []
    for h in range(H):          # static unroll; all heads in one grid step
        sl = slice(h * Dh, (h + 1) * Dh)
        qh, kh, vh = q[:, sl], k[:, sl], v[:, sl]
        # contract the Dh axes of both operands directly (no explicit k.T)
        s = lax.dot_general(qh, kh, (((1,), (1,)), ((), ())),
                            preferred_element_type=jnp.float32) * scale
        s = s - jnp.max(s, axis=-1, keepdims=True)
        p = jnp.exp(s)
        p = p * pl.reciprocal(jnp.sum(p, axis=-1, keepdims=True), approx=True)
        outs.append(jnp.dot(p.astype(dtype), vh, preferred_element_type=jnp.float32))
    return jnp.concatenate(outs, axis=-1)   # (Nq, C) f32


# ---------------------------------------------------------------------------
# Fused Pallas kernels
# ---------------------------------------------------------------------------
def _self_attn_kernel(x_ref, g_ref, b_ref, wqkv_ref, wproj_ref, bproj_ref,
                      *out_refs, scale, H, eps, mode):
    # LN -> qkv -> multi-head attention -> projection (+ residual)
    x = x_ref[...]                                                  # (N, C)
    dtype = x.dtype
    xn = _layernorm_f32(x, g_ref[...], b_ref[...], eps).astype(dtype)
    qkv = jnp.dot(xn, wqkv_ref[...],
                  preferred_element_type=jnp.float32).astype(dtype)  # (N, 3C)
    C = x.shape[-1]
    q, k, v = qkv[:, :C], qkv[:, C:2 * C], qkv[:, 2 * C:]
    o = _mha(q, k, v, H, scale, dtype).astype(dtype)                 # (N, C)
    attn = (jnp.dot(o, wproj_ref[...], preferred_element_type=jnp.float32)
            + bproj_ref[...].astype(jnp.float32))                    # (N, C) f32
    if mode == "pre":
        out_refs[0][...] = attn.astype(out_refs[0].dtype)
    elif mode == "post":
        out_refs[0][...] = (x.astype(jnp.float32) + attn).astype(out_refs[0].dtype)
    else:  # "both": pre-residual output AND residual sum
        out_refs[0][...] = attn.astype(out_refs[0].dtype)
        out_refs[1][...] = (x.astype(jnp.float32) + attn).astype(out_refs[1].dtype)


def _cross_attn_kernel(x_ref, y_ref, wq_ref, wkv_ref, wproj_ref, bproj_ref,
                       o_ref, *, scale, H):
    # q/kv projections -> multi-head attention -> projection -> residual(x)
    x = x_ref[...]                                                   # (Nq, C)
    y = y_ref[...]                                                   # (Nk, C)
    dtype = x.dtype
    C = x.shape[-1]
    q = jnp.dot(x, wq_ref[...], preferred_element_type=jnp.float32).astype(dtype)
    kv = jnp.dot(y, wkv_ref[...], preferred_element_type=jnp.float32).astype(dtype)
    k, v = kv[:, :C], kv[:, C:]
    o = _mha(q, k, v, H, scale, dtype).astype(dtype)
    attn = (jnp.dot(o, wproj_ref[...], preferred_element_type=jnp.float32)
            + bproj_ref[...].astype(jnp.float32))
    o_ref[...] = (x.astype(jnp.float32) + attn).astype(o_ref.dtype)


def _mlp_kernel(x_ref, g_ref, b_ref, w1_ref, b1_ref, w2_ref, b2_ref, o_ref, *, eps):
    # LN -> fc1 -> GELU -> fc2 -> residual, hidden never leaves VMEM
    x = x_ref[...]                                                   # (tm, C)
    dtype = x.dtype
    xn = _layernorm_f32(x, g_ref[...], b_ref[...], eps).astype(dtype)
    h = (jnp.dot(xn, w1_ref[...], preferred_element_type=jnp.float32)
         + b1_ref[...].astype(jnp.float32))
    h = _gelu_exact(h).astype(dtype)
    out = (jnp.dot(h, w2_ref[...], preferred_element_type=jnp.float32)
           + b2_ref[...].astype(jnp.float32))
    o_ref[...] = (x.astype(jnp.float32) + out).astype(o_ref.dtype)


# ---------------------------------------------------------------------------
# pallas_call wrappers
# ---------------------------------------------------------------------------
def _cparams():
    return pltpu.CompilerParams(dimension_semantics=("parallel",),
                                vmem_limit_bytes=_VMEM_LIMIT)


def _row_tile(M, target=256):
    """Row-tile size for the MLP kernel: biggest multiple of 8 <= target that
    divides M, else the full M for small inputs, else `target` (masked tail)."""
    if M <= target:
        return M
    for t in range(target, 7, -8):
        if M % t == 0:
            return t
    return target


def fused_self_attention(x, gamma, beta, wqkv, wproj, bproj, H, scale,
                         mode="post", eps=_LN_EPS):
    B, N, C = x.shape
    act_spec = pl.BlockSpec((None, N, C), lambda b: (b, 0, 0))
    vec_spec = pl.BlockSpec((1, C), lambda b: (0, 0))
    in_specs = [act_spec, vec_spec, vec_spec,
                pl.BlockSpec((C, 3 * C), lambda b: (0, 0)),
                pl.BlockSpec((C, C), lambda b: (0, 0)),
                vec_spec]
    if mode == "both":
        out_shape = (jax.ShapeDtypeStruct((B, N, C), x.dtype),
                     jax.ShapeDtypeStruct((B, N, C), x.dtype))
        out_specs = (act_spec, act_spec)
    else:
        out_shape = jax.ShapeDtypeStruct((B, N, C), x.dtype)
        out_specs = act_spec
    return pl.pallas_call(
        partial(_self_attn_kernel, scale=scale, H=H, eps=eps, mode=mode),
        out_shape=out_shape,
        grid=(B,),
        in_specs=in_specs,
        out_specs=out_specs,
        compiler_params=_cparams(),
    )(x, gamma.reshape(1, C), beta.reshape(1, C), wqkv, wproj, bproj.reshape(1, C))


def fused_cross_attention(x, y, wq, wkv, wproj, bproj, H, scale):
    B, Nq, C = x.shape
    Nk = y.shape[1]
    x_spec = pl.BlockSpec((None, Nq, C), lambda b: (b, 0, 0))
    y_spec = pl.BlockSpec((None, Nk, C), lambda b: (b, 0, 0))
    vec_spec = pl.BlockSpec((1, C), lambda b: (0, 0))
    return pl.pallas_call(
        partial(_cross_attn_kernel, scale=scale, H=H),
        out_shape=jax.ShapeDtypeStruct((B, Nq, C), x.dtype),
        grid=(B,),
        in_specs=[x_spec, y_spec,
                  pl.BlockSpec((C, C), lambda b: (0, 0)),
                  pl.BlockSpec((C, 2 * C), lambda b: (0, 0)),
                  pl.BlockSpec((C, C), lambda b: (0, 0)),
                  vec_spec],
        out_specs=x_spec,
        compiler_params=_cparams(),
    )(x, y, wq, wkv, wproj, bproj.reshape(1, C))


def fused_mlp(x, gamma, beta, w1, b1, w2, b2, eps=_LN_EPS):
    B, N, C = x.shape
    Hd = w1.shape[1]
    M = B * N
    x2 = x.reshape(M, C)
    tm = _row_tile(M)
    out = pl.pallas_call(
        partial(_mlp_kernel, eps=eps),
        out_shape=jax.ShapeDtypeStruct((M, C), x.dtype),
        grid=(pl.cdiv(M, tm),),
        in_specs=[pl.BlockSpec((tm, C), lambda i: (i, 0)),
                  pl.BlockSpec((1, C), lambda i: (0, 0)),
                  pl.BlockSpec((1, C), lambda i: (0, 0)),
                  pl.BlockSpec((C, Hd), lambda i: (0, 0)),
                  pl.BlockSpec((1, Hd), lambda i: (0, 0)),
                  pl.BlockSpec((Hd, C), lambda i: (0, 0)),
                  pl.BlockSpec((1, C), lambda i: (0, 0))],
        out_specs=pl.BlockSpec((tm, C), lambda i: (i, 0)),
        compiler_params=_cparams(),
    )(x2, gamma.reshape(1, C), beta.reshape(1, C),
      w1, b1.reshape(1, Hd), w2, b2.reshape(1, C))
    return out.reshape(B, N, C)


# ---------------------------------------------------------------------------
# CrossBlock forward (dropout / DropPath are identity at p=0.0)
# ---------------------------------------------------------------------------
def cross_block(params, x, y, H):
    p = params
    C = x.shape[-1]
    Dh = C // H
    scale = Dh ** (-0.5)

    # y_ = attn1(norm1(y)); y = y + y_   (kernel emits both outputs)
    y_, y = fused_self_attention(y, p["norm1_g"], p["norm1_b"],
                                 p["attn1_wqkv"], p["attn1_wproj"], p["attn1_bproj"],
                                 H, scale, mode="both")
    # y = y + mlp1(norm2(y))
    y = fused_mlp(y, p["norm2_g"], p["norm2_b"],
                  p["mlp1_w1"], p["mlp1_b1"], p["mlp1_w2"], p["mlp1_b2"])
    # x = x + attn2(norm3(x))
    x = fused_self_attention(x, p["norm3_g"], p["norm3_b"],
                             p["attn2_wqkv"], p["attn2_wproj"], p["attn2_bproj"],
                             H, scale, mode="post")
    # x = x + cross_attn(x, y_)   (pre-residual y_, un-normed x; residual fused)
    x = fused_cross_attention(x, y_, p["ca_wq"], p["ca_wkv"],
                              p["ca_wproj"], p["ca_bproj"], H, scale)
    # x = x + mlp2(norm4(x))
    x = fused_mlp(x, p["norm4_g"], p["norm4_b"],
                  p["mlp2_w1"], p["mlp2_b1"], p["mlp2_w2"], p["mlp2_b2"])
    return x, y


# ---------------------------------------------------------------------------
# Deterministic synthetic parameters (weights stored as (in, out) = W^T of
# torch's nn.Linear; forward computes x @ W + b, matching torch).
# ---------------------------------------------------------------------------
def init_params(key, C, H, hidden):
    ks = iter(jax.random.split(key, 32))
    w = lambda shape: jax.random.normal(next(ks), shape, jnp.float32) * 0.02
    ln_g = lambda: 1.0 + 0.1 * jax.random.normal(next(ks), (C,), jnp.float32)
    ln_b = lambda: 0.1 * jax.random.normal(next(ks), (C,), jnp.float32)
    return dict(
        norm1_g=ln_g(), norm1_b=ln_b(),
        attn1_wqkv=w((C, 3 * C)), attn1_wproj=w((C, C)), attn1_bproj=w((C,)),
        norm2_g=ln_g(), norm2_b=ln_b(),
        mlp1_w1=w((C, hidden)), mlp1_b1=w((hidden,)), mlp1_w2=w((hidden, C)), mlp1_b2=w((C,)),
        norm3_g=ln_g(), norm3_b=ln_b(),
        attn2_wqkv=w((C, 3 * C)), attn2_wproj=w((C, C)), attn2_bproj=w((C,)),
        ca_wq=w((C, C)), ca_wkv=w((C, 2 * C)), ca_wproj=w((C, C)), ca_bproj=w((C,)),
        norm4_g=ln_g(), norm4_b=ln_b(),
        mlp2_w1=w((C, hidden)), mlp2_b1=w((hidden,)), mlp2_w2=w((hidden, C)), mlp2_b2=w((C,)),
    )


# ---------------------------------------------------------------------------
# Pure-JAX reference (same math as the PyTorch module) for a sanity check
# ---------------------------------------------------------------------------
def ref_cross_block(params, x, y, H):
    p = params

    def ln(z, g, b):
        m = z.mean(-1, keepdims=True)
        v = ((z - m) ** 2).mean(-1, keepdims=True)
        return (z - m) * jax.lax.rsqrt(v + 1e-5) * g + b

    def gelu(z):
        return 0.5 * z * (1.0 + jax.scipy.special.erf(z / jnp.sqrt(2.0)))

    def attn(z, wqkv, wproj, bproj):
        B, N, C = z.shape
        Dh = C // H
        qkv = (z @ wqkv).reshape(B, N, 3, H, Dh).transpose(2, 0, 3, 1, 4)
        q, k, v = qkv[0], qkv[1], qkv[2]
        a = jax.nn.softmax((q @ jnp.swapaxes(k, -2, -1)) * (Dh ** -0.5), axis=-1)
        o = (a @ v).transpose(0, 2, 1, 3).reshape(B, N, C)
        return o @ wproj + bproj

    def cattn(zx, zy, wq, wkv, wproj, bproj):
        B, Nq, C = zx.shape
        Nk = zy.shape[1]
        Dh = C // H
        q = (zx @ wq).reshape(B, Nq, H, Dh).transpose(0, 2, 1, 3)
        kv = (zy @ wkv).reshape(B, Nk, 2, H, Dh).transpose(2, 0, 3, 1, 4)
        k, v = kv[0], kv[1]
        a = jax.nn.softmax((q @ jnp.swapaxes(k, -2, -1)) * (Dh ** -0.5), axis=-1)
        o = (a @ v).transpose(0, 2, 1, 3).reshape(B, Nq, C)
        return o @ wproj + bproj

    def mlp_(z, w1, b1, w2, b2):
        return gelu(z @ w1 + b1) @ w2 + b2

    y_ = attn(ln(y, p["norm1_g"], p["norm1_b"]), p["attn1_wqkv"], p["attn1_wproj"], p["attn1_bproj"])
    y = y + y_
    y = y + mlp_(ln(y, p["norm2_g"], p["norm2_b"]), p["mlp1_w1"], p["mlp1_b1"], p["mlp1_w2"], p["mlp1_b2"])
    x = x + attn(ln(x, p["norm3_g"], p["norm3_b"]), p["attn2_wqkv"], p["attn2_wproj"], p["attn2_bproj"])
    x = x + cattn(x, y_, p["ca_wq"], p["ca_wkv"], p["ca_wproj"], p["ca_bproj"])
    x = x + mlp_(ln(x, p["norm4_g"], p["norm4_b"]), p["mlp2_w1"], p["mlp2_b1"], p["mlp2_w2"], p["mlp2_b2"])
    return x, y


if __name__ == "__main__":
    B, Nx, Ny, C, H = 2, 8, 8, 32, 4
    hidden = int(C * 4.0)

    key = jax.random.PRNGKey(0)
    kx, ky, kp = jax.random.split(key, 3)
    x = jax.random.normal(kx, (B, Nx, C), jnp.float32)
    y = jax.random.normal(ky, (B, Ny, C), jnp.float32)
    params = init_params(kp, C, H, hidden)

    fwd = jax.jit(partial(cross_block, H=H))
    x_out, y_out = fwd(params, x, y)
    jax.block_until_ready((x_out, y_out))

    x_ref, y_ref = ref_cross_block(params, x, y, H)
    assert x_out.shape == (B, Nx, C) and y_out.shape == (B, Ny, C)
    assert jnp.allclose(x_out, x_ref, atol=2e-3, rtol=2e-3)
    assert jnp.allclose(y_out, y_ref, atol=2e-3, rtol=2e-3)
    print("KERNEL_OK")
</pallas_src>

<mosaic_0001>
module attributes {stable_mosaic.version = 11 : i64} {
  func.func @_cross_attn_kernel(%arg0: i32, %arg1: memref<1x8x32xf32, #tpu.memory_space<vmem>>, %arg2: memref<1x8x32xf32, #tpu.memory_space<vmem>>, %arg3: memref<32x32xf32, #tpu.memory_space<vmem>>, %arg4: memref<32x64xf32, #tpu.memory_space<vmem>>, %arg5: memref<32x32xf32, #tpu.memory_space<vmem>>, %arg6: memref<1x32xf32, #tpu.memory_space<vmem>>, %arg7: memref<1x8x32xf32, #tpu.memory_space<vmem>>) attributes {dimension_semantics = [#tpu.dimension_semantics<parallel>], iteration_bounds = array<i64: 2>, scalar_prefetch = 0 : i64, scratch_operands = 0 : i64, tpu.core_type = #tpu.core_type<tc>, window_params = [{transform_indices = @transform_0, window_bounds = array<i64: 1, 8, 32>}, {transform_indices = @transform_1, window_bounds = array<i64: 1, 8, 32>}, {pipeline_mode = #tpu.pipeline_mode<synchronous>, transform_indices = @transform_2, window_bounds = array<i64: 32, 32>}, {pipeline_mode = #tpu.pipeline_mode<synchronous>, transform_indices = @transform_3, window_bounds = array<i64: 32, 64>}, {pipeline_mode = #tpu.pipeline_mode<synchronous>, transform_indices = @transform_4, window_bounds = array<i64: 32, 32>}, {pipeline_mode = #tpu.pipeline_mode<synchronous>, transform_indices = @transform_5, window_bounds = array<i64: 1, 32>}, {transform_indices = @transform_6, window_bounds = array<i64: 1, 8, 32>}]} {
    %c0 = arith.constant 0 : index
    %c0_0 = arith.constant 0 : index
    %c0_1 = arith.constant 0 : index
    %0 = vector.load %arg1[%c0, %c0_0, %c0_1] : memref<1x8x32xf32, #tpu.memory_space<vmem>>, vector<1x8x32xf32>
    %1 = vector.shape_cast %0 : vector<1x8x32xf32> to vector<8x32xf32>
    %c0_2 = arith.constant 0 : index
    %c0_3 = arith.constant 0 : index
    %c0_4 = arith.constant 0 : index
    %2 = vector.load %arg2[%c0_2, %c0_3, %c0_4] : memref<1x8x32xf32, #tpu.memory_space<vmem>>, vector<1x8x32xf32>
    %3 = vector.shape_cast %2 : vector<1x8x32xf32> to vector<8x32xf32>
    %c0_5 = arith.constant 0 : index
    %c0_6 = arith.constant 0 : index
    %4 = vector.load %arg3[%c0_5, %c0_6] : memref<32x32xf32, #tpu.memory_space<vmem>>, vector<32x32xf32>
    %cst = arith.constant dense<0.000000e+00> : vector<8x32xf32>
    %5 = tpu.matmul %1, %4, %cst {dimension_numbers = #tpu.dot_dimension_numbers<[1], [0], [0], [1], [0, 0, 1, 1], [], []>} : vector<8x32xf32>, vector<32x32xf32>, vector<8x32xf32> -> vector<8x32xf32>
    %c0_7 = arith.constant 0 : index
    %c0_8 = arith.constant 0 : index
    %6 = vector.load %arg4[%c0_7, %c0_8] : memref<32x64xf32, #tpu.memory_space<vmem>>, vector<32x64xf32>
    %cst_9 = arith.constant dense<0.000000e+00> : vector<8x64xf32>
    %7 = tpu.matmul %3, %6, %cst_9 {dimension_numbers = #tpu.dot_dimension_numbers<[1], [0], [0], [1], [0, 0, 1, 1], [], []>} : vector<8x32xf32>, vector<32x64xf32>, vector<8x64xf32> -> vector<8x64xf32>
    %8 = vector.extract_strided_slice %7 {offsets = [0, 0], sizes = [8, 32], strides = [1, 1]} : vector<8x64xf32> to vector<8x32xf32>
    %9 = vector.extract_strided_slice %7 {offsets = [0, 32], sizes = [8, 32], strides = [1, 1]} : vector<8x64xf32> to vector<8x32xf32>
    %10 = vector.extract_strided_slice %5 {offsets = [0, 0], sizes = [8, 8], strides = [1, 1]} : vector<8x32xf32> to vector<8x8xf32>
    %11 = vector.extract_strided_slice %8 {offsets = [0, 0], sizes = [8, 8], strides = [1, 1]} : vector<8x32xf32> to vector<8x8xf32>
    %12 = vector.extract_strided_slice %9 {offsets = [0, 0], sizes = [8, 8], strides = [1, 1]} : vector<8x32xf32> to vector<8x8xf32>
    %cst_10 = arith.constant dense<0.000000e+00> : vector<8x8xf32>
    %13 = tpu.matmul %10, %11, %cst_10 {dimension_numbers = #tpu.dot_dimension_numbers<[1], [1], [0], [0], [0, 0, 1, 0], [], []>} : vector<8x8xf32>, vector<8x8xf32>, vector<8x8xf32> -> vector<8x8xf32>
    %cst_11 = arith.constant 0.353553385 : f32
    %14 = vector.broadcast %cst_11 : f32 to vector<8x8xf32>
    %15 = arith.mulf %13, %14 : vector<8x8xf32>
    %cst_12 = arith.constant dense<0xFF800000> : vector<8xf32>
    %16 = vector.multi_reduction <maximumf>, %15, %cst_12 [1] : vector<8x8xf32> to vector<8xf32>
    %17 = vector.shape_cast %16 : vector<8xf32> to vector<8x1xf32>
    %18 = vector.broadcast %17 : vector<8x1xf32> to vector<8x8xf32>
    %19 = arith.subf %15, %18 : vector<8x8xf32>
    %20 = math.exp %19 : vector<8x8xf32>
    %cst_13 = arith.constant dense<0.000000e+00> : vector<8xf32>
    %21 = vector.multi_reduction <add>, %20, %cst_13 [1] : vector<8x8xf32> to vector<8xf32>
    %22 = vector.shape_cast %21 : vector<8xf32> to vector<8x1xf32>
    %23 = tpu.reciprocal %22 {approx = true} : vector<8x1xf32> -> vector<8x1xf32>
    %24 = vector.broadcast %23 : vector<8x1xf32> to vector<8x8xf32>
    %25 = arith.mulf %20, %24 : vector<8x8xf32>
    %cst_14 = arith.constant dense<0.000000e+00> : vector<8x8xf32>
    %26 = tpu.matmul %25, %12, %cst_14 {dimension_numbers = #tpu.dot_dimension_numbers<[1], [0], [0], [1], [0, 0, 1, 1], [], []>} : vector<8x8xf32>, vector<8x8xf32>, vector<8x8xf32> -> vector<8x8xf32>
    %27 = vector.extract_strided_slice %5 {offsets = [0, 8], sizes = [8, 8], strides = [1, 1]} : vector<8x32xf32> to vector<8x8xf32>
    %28 = vector.extract_strided_slice %8 {offsets = [0, 8], sizes = [8, 8], strides = [1, 1]} : vector<8x32xf32> to vector<8x8xf32>
    %29 = vector.extract_strided_slice %9 {offsets = [0, 8], sizes = [8, 8], strides = [1, 1]} : vector<8x32xf32> to vector<8x8xf32>
    %cst_15 = arith.constant dense<0.000000e+00> : vector<8x8xf32>
    %30 = tpu.matmul %27, %28, %cst_15 {dimension_numbers = #tpu.dot_dimension_numbers<[1], [1], [0], [0], [0, 0, 1, 0], [], []>} : vector<8x8xf32>, vector<8x8xf32>, vector<8x8xf32> -> vector<8x8xf32>
    %cst_16 = arith.constant 0.353553385 : f32
    %31 = vector.broadcast %cst_16 : f32 to vector<8x8xf32>
    %32 = arith.mulf %30, %31 : vector<8x8xf32>
    %cst_17 = arith.constant dense<0xFF800000> : vector<8xf32>
    %33 = vector.multi_reduction <maximumf>, %32, %cst_17 [1] : vector<8x8xf32> to vector<8xf32>
    %34 = vector.shape_cast %33 : vector<8xf32> to vector<8x1xf32>
    %35 = vector.broadcast %34 : vector<8x1xf32> to vector<8x8xf32>
    %36 = arith.subf %32, %35 : vector<8x8xf32>
    %37 = math.exp %36 : vector<8x8xf32>
    %cst_18 = arith.constant dense<0.000000e+00> : vector<8xf32>
    %38 = vector.multi_reduction <add>, %37, %cst_18 [1] : vector<8x8xf32> to vector<8xf32>
    %39 = vector.shape_cast %38 : vector<8xf32> to vector<8x1xf32>
    %40 = tpu.reciprocal %39 {approx = true} : vector<8x1xf32> -> vector<8x1xf32>
    %41 = vector.broadcast %40 : vector<8x1xf32> to vector<8x8xf32>
    %42 = arith.mulf %37, %41 : vector<8x8xf32>
    %cst_19 = arith.constant dense<0.000000e+00> : vector<8x8xf32>
    %43 = tpu.matmul %42, %29, %cst_19 {dimension_numbers = #tpu.dot_dimension_numbers<[1], [0], [0], [1], [0, 0, 1, 1], [], []>} : vector<8x8xf32>, vector<8x8xf32>, vector<8x8xf32> -> vector<8x8xf32>
    %44 = vector.extract_strided_slice %5 {offsets = [0, 16], sizes = [8, 8], strides = [1, 1]} : vector<8x32xf32> to vector<8x8xf32>
    %45 = vector.extract_strided_slice %8 {offsets = [0, 16], sizes = [8, 8], strides = [1, 1]} : vector<8x32xf32> to vector<8x8xf32>
    %46 = vector.extract_strided_slice %9 {offsets = [0, 16], sizes = [8, 8], strides = [1, 1]} : vector<8x32xf32> to vector<8x8xf32>
    %cst_20 = arith.constant dense<0.000000e+00> : vector<8x8xf32>
    %47 = tpu.matmul %44, %45, %cst_20 {dimension_numbers = #tpu.dot_dimension_numbers<[1], [1], [0], [0], [0, 0, 1, 0], [], []>} : vector<8x8xf32>, vector<8x8xf32>, vector<8x8xf32> -> vector<8x8xf32>
    %cst_21 = arith.constant 0.353553385 : f32
    %48 = vector.broadcast %cst_21 : f32 to vector<8x8xf32>
    %49 = arith.mulf %47, %48 : vector<8x8xf32>
    %cst_22 = arith.constant dense<0xFF800000> : vector<8xf32>
    %50 = vector.multi_reduction <maximumf>, %49, %cst_22 [1] : vector<8x8xf32> to vector<8xf32>
    %51 = vector.shape_cast %50 : vector<8xf32> to vector<8x1xf32>
    %52 = vector.broadcast %51 : vector<8x1xf32> to vector<8x8xf32>
    %53 = arith.subf %49, %52 : vector<8x8xf32>
    %54 = math.exp %53 : vector<8x8xf32>
    %cst_23 = arith.constant dense<0.000000e+00> : vector<8xf32>
    %55 = vector.multi_reduction <add>, %54, %cst_23 [1] : vector<8x8xf32> to vector<8xf32>
    %56 = vector.shape_cast %55 : vector<8xf32> to vector<8x1xf32>
    %57 = tpu.reciprocal %56 {approx = true} : vector<8x1xf32> -> vector<8x1xf32>
    %58 = vector.broadcast %57 : vector<8x1xf32> to vector<8x8xf32>
    %59 = arith.mulf %54, %58 : vector<8x8xf32>
    %cst_24 = arith.constant dense<0.000000e+00> : vector<8x8xf32>
    %60 = tpu.matmul %59, %46, %cst_24 {dimension_numbers = #tpu.dot_dimension_numbers<[1], [0], [0], [1], [0, 0, 1, 1], [], []>} : vector<8x8xf32>, vector<8x8xf32>, vector<8x8xf32> -> vector<8x8xf32>
    %61 = vector.extract_strided_slice %5 {offsets = [0, 24], sizes = [8, 8], strides = [1, 1]} : vector<8x32xf32> to vector<8x8xf32>
    %62 = vector.extract_strided_slice %8 {offsets = [0, 24], sizes = [8, 8], strides = [1, 1]} : vector<8x32xf32> to vector<8x8xf32>
    %63 = vector.extract_strided_slice %9 {offsets = [0, 24], sizes = [8, 8], strides = [1, 1]} : vector<8x32xf32> to vector<8x8xf32>
    %cst_25 = arith.constant dense<0.000000e+00> : vector<8x8xf32>
    %64 = tpu.matmul %61, %62, %cst_25 {dimension_numbers = #tpu.dot_dimension_numbers<[1], [1], [0], [0], [0, 0, 1, 0], [], []>} : vector<8x8xf32>, vector<8x8xf32>, vector<8x8xf32> -> vector<8x8xf32>
    %cst_26 = arith.constant 0.353553385 : f32
    %65 = vector.broadcast %cst_26 : f32 to vector<8x8xf32>
    %66 = arith.mulf %64, %65 : vector<8x8xf32>
    %cst_27 = arith.constant dense<0xFF800000> : vector<8xf32>
    %67 = vector.multi_reduction <maximumf>, %66, %cst_27 [1] : vector<8x8xf32> to vector<8xf32>
    %68 = vector.shape_cast %67 : vector<8xf32> to vector<8x1xf32>
    %69 = vector.broadcast %68 : vector<8x1xf32> to vector<8x8xf32>
    %70 = arith.subf %66, %69 : vector<8x8xf32>
    %71 = math.exp %70 : vector<8x8xf32>
    %cst_28 = arith.constant dense<0.000000e+00> : vector<8xf32>
    %72 = vector.multi_reduction <add>, %71, %cst_28 [1] : vector<8x8xf32> to vector<8xf32>
    %73 = vector.shape_cast %72 : vector<8xf32> to vector<8x1xf32>
    %74 = tpu.reciprocal %73 {approx = true} : vector<8x1xf32> -> vector<8x1xf32>
    %75 = vector.broadcast %74 : vector<8x1xf32> to vector<8x8xf32>
    %76 = arith.mulf %71, %75 : vector<8x8xf32>
    %cst_29 = arith.constant dense<0.000000e+00> : vector<8x8xf32>
    %77 = tpu.matmul %76, %63, %cst_29 {dimension_numbers = #tpu.dot_dimension_numbers<[1], [0], [0], [1], [0, 0, 1, 1], [], []>} : vector<8x8xf32>, vector<8x8xf32>, vector<8x8xf32> -> vector<8x8xf32>
    %78 = tpu.concatenate %26, %43, %60, %77 in 1 : vector<8x8xf32>, vector<8x8xf32>, vector<8x8xf32>, vector<8x8xf32> -> vector<8x32xf32>
    %c0_30 = arith.constant 0 : index
    %c0_31 = arith.constant 0 : index
    %79 = vector.load %arg5[%c0_30, %c0_31] : memref<32x32xf32, #tpu.memory_space<vmem>>, vector<32x32xf32>
    %cst_32 = arith.constant dense<0.000000e+00> : vector<8x32xf32>
    %80 = tpu.matmul %78, %79, %cst_32 {dimension_numbers = #tpu.dot_dimension_numbers<[1], [0], [0], [1], [0, 0, 1, 1], [], []>} : vector<8x32xf32>, vector<32x32xf32>, vector<8x32xf32> -> vector<8x32xf32>
    %c0_33 = arith.constant 0 : index
    %c0_34 = arith.constant 0 : index
    %81 = vector.load %arg6[%c0_33, %c0_34] : memref<1x32xf32, #tpu.memory_space<vmem>>, vector<1x32xf32>
    %82 = vector.broadcast %81 : vector<1x32xf32> to vector<8x32xf32>
    %83 = arith.addf %80, %82 : vector<8x32xf32>
    %84 = arith.addf %1, %83 : vector<8x32xf32>
    %c0_35 = arith.constant 0 : index
    %c0_36 = arith.constant 0 : index
    %c0_37 = arith.constant 0 : index
    %85 = vector.load %arg7[%c0_35, %c0_36, %c0_37] : memref<1x8x32xf32, #tpu.memory_space<vmem>>, vector<1x8x32xf32>
    %86 = vector.shape_cast %85 : vector<1x8x32xf32> to vector<8x32xf32>
    %87 = vector.shape_cast %84 : vector<8x32xf32> to vector<1x8x32xf32>
    tpu.vector_store %arg7[%c0_35, %c0_36, %c0_37], %87 {strides = array<i32>} : memref<1x8x32xf32, #tpu.memory_space<vmem>>, vector<1x8x32xf32>,
    return
  }
  func.func @transform_0(%arg0: i32) -> (i32, i32, i32) {
    %c0_i32 = arith.constant 0 : i32
    %c0_i32_0 = arith.constant 0 : i32
    %c0_i32_1 = arith.constant 0 : i32
    return %arg0, %c0_i32, %c0_i32_0 : i32, i32, i32
  }
  func.func @transform_1(%arg0: i32) -> (i32, i32, i32) {
    %c0_i32 = arith.constant 0 : i32
    %c0_i32_0 = arith.constant 0 : i32
    %c0_i32_1 = arith.constant 0 : i32
    return %arg0, %c0_i32, %c0_i32_0 : i32, i32, i32
  }
  func.func @transform_2(%arg0: i32) -> (i32, i32) {
    %c0_i32 = arith.constant 0 : i32
    %c0_i32_0 = arith.constant 0 : i32
    %c0_i32_1 = arith.constant 0 : i32
    return %c0_i32, %c0_i32_0 : i32, i32
  }
  func.func @transform_3(%arg0: i32) -> (i32, i32) {
    %c0_i32 = arith.constant 0 : i32
    %c0_i32_0 = arith.constant 0 : i32
    %c0_i32_1 = arith.constant 0 : i32
    return %c0_i32, %c0_i32_0 : i32, i32
  }
  func.func @transform_4(%arg0: i32) -> (i32, i32) {
    %c0_i32 = arith.constant 0 : i32
    %c0_i32_0 = arith.constant 0 : i32
    %c0_i32_1 = arith.constant 0 : i32
    return %c0_i32, %c0_i32_0 : i32, i32
  }
  func.func @transform_5(%arg0: i32) -> (i32, i32) {
    %c0_i32 = arith.constant 0 : i32
    %c0_i32_0 = arith.constant 0 : i32
    %c0_i32_1 = arith.constant 0 : i32
    return %c0_i32, %c0_i32_0 : i32, i32
  }
  func.func @transform_6(%arg0: i32) -> (i32, i32, i32) {
    %c0_i32 = arith.constant 0 : i32
    %c0_i32_0 = arith.constant 0 : i32
    %c0_i32_1 = arith.constant 0 : i32
    return %arg0, %c0_i32, %c0_i32_0 : i32, i32, i32
  }
}

module attributes {stable_mosaic.version = 11 : i64} {
  func.func @_self_attn_kernel(%arg0: i32, %arg1: memref<1x8x32xf32, #tpu.memory_space<vmem>>, %arg2: memref<1x32xf32, #tpu.memory_space<vmem>>, %arg3: memref<1x32xf32, #tpu.memory_space<vmem>>, %arg4: memref<32x96xf32, #tpu.memory_space<vmem>>, %arg5: memref<32x32xf32, #tpu.memory_space<vmem>>, %arg6: memref<1x32xf32, #tpu.memory_space<vmem>>, %arg7: memref<1x8x32xf32, #tpu.memory_space<vmem>>) attributes {dimension_semantics = [#tpu.dimension_semantics<parallel>], iteration_bounds = array<i64: 2>, scalar_prefetch = 0 : i64, scratch_operands = 0 : i64, tpu.core_type = #tpu.core_type<tc>, window_params = [{transform_indices = @transform_0, window_bounds = array<i64: 1, 8, 32>}, {pipeline_mode = #tpu.pipeline_mode<synchronous>, transform_indices = @transform_1, window_bounds = array<i64: 1, 32>}, {pipeline_mode = #tpu.pipeline_mode<synchronous>, transform_indices = @transform_2, window_bounds = array<i64: 1, 32>}, {pipeline_mode = #tpu.pipeline_mode<synchronous>, transform_indices = @transform_3, window_bounds = array<i64: 32, 96>}, {pipeline_mode = #tpu.pipeline_mode<synchronous>, transform_indices = @transform_4, window_bounds = array<i64: 32, 32>}, {pipeline_mode = #tpu.pipeline_mode<synchronous>, transform_indices = @transform_5, window_bounds = array<i64: 1, 32>}, {transform_indices = @transform_6, window_bounds = array<i64: 1, 8, 32>}]} {
    %c0 = arith.constant 0 : index
    %c0_0 = arith.constant 0 : index
    %c0_1 = arith.constant 0 : index
    %0 = vector.load %arg1[%c0, %c0_0, %c0_1] : memref<1x8x32xf32, #tpu.memory_space<vmem>>, vector<1x8x32xf32>
    %1 = vector.shape_cast %0 : vector<1x8x32xf32> to vector<8x32xf32>
    %c0_2 = arith.constant 0 : index
    %c0_3 = arith.constant 0 : index
    %2 = vector.load %arg2[%c0_2, %c0_3] : memref<1x32xf32, #tpu.memory_space<vmem>>, vector<1x32xf32>
    %c0_4 = arith.constant 0 : index
    %c0_5 = arith.constant 0 : index
    %3 = vector.load %arg3[%c0_4, %c0_5] : memref<1x32xf32, #tpu.memory_space<vmem>>, vector<1x32xf32>
    %cst = arith.constant dense<0.000000e+00> : vector<8xf32>
    %4 = vector.multi_reduction <add>, %1, %cst [1] : vector<8x32xf32> to vector<8xf32>
    %5 = vector.shape_cast %4 : vector<8xf32> to vector<8x1xf32>
    %cst_6 = arith.constant 3.200000e+01 : f32
    %6 = vector.broadcast %cst_6 : f32 to vector<8x1xf32>
    %7 = arith.divf %5, %6 : vector<8x1xf32>
    %8 = vector.broadcast %7 : vector<8x1xf32> to vector<8x32xf32>
    %9 = arith.subf %1, %8 : vector<8x32xf32>
    %10 = arith.mulf %9, %9 : vector<8x32xf32>
    %cst_7 = arith.constant dense<0.000000e+00> : vector<8xf32>
    %11 = vector.multi_reduction <add>, %10, %cst_7 [1] : vector<8x32xf32> to vector<8xf32>
    %12 = vector.shape_cast %11 : vector<8xf32> to vector<8x1xf32>
    %cst_8 = arith.constant 3.200000e+01 : f32
    %13 = vector.broadcast %cst_8 : f32 to vector<8x1xf32>
    %14 = arith.divf %12, %13 : vector<8x1xf32>
    %cst_9 = arith.constant 9.99999974E-6 : f32
    %15 = vector.broadcast %cst_9 : f32 to vector<8x1xf32>
    %16 = arith.addf %14, %15 : vector<8x1xf32>
    %17 = math.rsqrt %16 : vector<8x1xf32>
    %18 = vector.broadcast %17 : vector<8x1xf32> to vector<8x32xf32>
    %19 = arith.mulf %9, %18 : vector<8x32xf32>
    %20 = vector.broadcast %2 : vector<1x32xf32> to vector<8x32xf32>
    %21 = arith.mulf %19, %20 : vector<8x32xf32>
    %22 = vector.broadcast %3 : vector<1x32xf32> to vector<8x32xf32>
    %23 = arith.addf %21, %22 : vector<8x32xf32>
    %c0_10 = arith.constant 0 : index
    %c0_11 = arith.constant 0 : index
    %24 = vector.load %arg4[%c0_10, %c0_11] : memref<32x96xf32, #tpu.memory_space<vmem>>, vector<32x96xf32>
    %cst_12 = arith.constant dense<0.000000e+00> : vector<8x96xf32>
    %25 = tpu.matmul %23, %24, %cst_12 {dimension_numbers = #tpu.dot_dimension_numbers<[1], [0], [0], [1], [0, 0, 1, 1], [], []>} : vector<8x32xf32>, vector<32x96xf32>, vector<8x96xf32> -> vector<8x96xf32>
    %26 = vector.extract_strided_slice %25 {offsets = [0, 0], sizes = [8, 32], strides = [1, 1]} : vector<8x96xf32> to vector<8x32xf32>
    %27 = vector.extract_strided_slice %25 {offsets = [0, 32], sizes = [8, 32], strides = [1, 1]} : vector<8x96xf32> to vector<8x32xf32>
    %28 = vector.extract_strided_slice %25 {offsets = [0, 64], sizes = [8, 32], strides = [1, 1]} : vector<8x96xf32> to vector<8x32xf32>
    %29 = vector.extract_strided_slice %26 {offsets = [0, 0], sizes = [8, 8], strides = [1, 1]} : vector<8x32xf32> to vector<8x8xf32>
    %30 = vector.extract_strided_slice %27 {offsets = [0, 0], sizes = [8, 8], strides = [1, 1]} : vector<8x32xf32> to vector<8x8xf32>
    %31 = vector.extract_strided_slice %28 {offsets = [0, 0], sizes = [8, 8], strides = [1, 1]} : vector<8x32xf32> to vector<8x8xf32>
    %cst_13 = arith.constant dense<0.000000e+00> : vector<8x8xf32>
    %32 = tpu.matmul %29, %30, %cst_13 {dimension_numbers = #tpu.dot_dimension_numbers<[1], [1], [0], [0], [0, 0, 1, 0], [], []>} : vector<8x8xf32>, vector<8x8xf32>, vector<8x8xf32> -> vector<8x8xf32>
    %cst_14 = arith.constant 0.353553385 : f32
    %33 = vector.broadcast %cst_14 : f32 to vector<8x8xf32>
    %34 = arith.mulf %32, %33 : vector<8x8xf32>
    %cst_15 = arith.constant dense<0xFF800000> : vector<8xf32>
    %35 = vector.multi_reduction <maximumf>, %34, %cst_15 [1] : vector<8x8xf32> to vector<8xf32>
    %36 = vector.shape_cast %35 : vector<8xf32> to vector<8x1xf32>
    %37 = vector.broadcast %36 : vector<8x1xf32> to vector<8x8xf32>
    %38 = arith.subf %34, %37 : vector<8x8xf32>
    %39 = math.exp %38 : vector<8x8xf32>
    %cst_16 = arith.constant dense<0.000000e+00> : vector<8xf32>
    %40 = vector.multi_reduction <add>, %39, %cst_16 [1] : vector<8x8xf32> to vector<8xf32>
    %41 = vector.shape_cast %40 : vector<8xf32> to vector<8x1xf32>
    %42 = tpu.reciprocal %41 {approx = true} : vector<8x1xf32> -> vector<8x1xf32>
    %43 = vector.broadcast %42 : vector<8x1xf32> to vector<8x8xf32>
    %44 = arith.mulf %39, %43 : vector<8x8xf32>
    %cst_17 = arith.constant dense<0.000000e+00> : vector<8x8xf32>
    %45 = tpu.matmul %44, %31, %cst_17 {dimension_numbers = #tpu.dot_dimension_numbers<[1], [0], [0], [1], [0, 0, 1, 1], [], []>} : vector<8x8xf32>, vector<8x8xf32>, vector<8x8xf32> -> vector<8x8xf32>
    %46 = vector.extract_strided_slice %26 {offsets = [0, 8], sizes = [8, 8], strides = [1, 1]} : vector<8x32xf32> to vector<8x8xf32>
    %47 = vector.extract_strided_slice %27 {offsets = [0, 8], sizes = [8, 8], strides = [1, 1]} : vector<8x32xf32> to vector<8x8xf32>
    %48 = vector.extract_strided_slice %28 {offsets = [0, 8], sizes = [8, 8], strides = [1, 1]} : vector<8x32xf32> to vector<8x8xf32>
    %cst_18 = arith.constant dense<0.000000e+00> : vector<8x8xf32>
    %49 = tpu.matmul %46, %47, %cst_18 {dimension_numbers = #tpu.dot_dimension_numbers<[1], [1], [0], [0], [0, 0, 1, 0], [], []>} : vector<8x8xf32>, vector<8x8xf32>, vector<8x8xf32> -> vector<8x8xf32>
    %cst_19 = arith.constant 0.353553385 : f32
    %50 = vector.broadcast %cst_19 : f32 to vector<8x8xf32>
    %51 = arith.mulf %49, %50 : vector<8x8xf32>
    %cst_20 = arith.constant dense<0xFF800000> : vector<8xf32>
    %52 = vector.multi_reduction <maximumf>, %51, %cst_20 [1] : vector<8x8xf32> to vector<8xf32>
    %53 = vector.shape_cast %52 : vector<8xf32> to vector<8x1xf32>
    %54 = vector.broadcast %53 : vector<8x1xf32> to vector<8x8xf32>
    %55 = arith.subf %51, %54 : vector<8x8xf32>
    %56 = math.exp %55 : vector<8x8xf32>
    %cst_21 = arith.constant dense<0.000000e+00> : vector<8xf32>
    %57 = vector.multi_reduction <add>, %56, %cst_21 [1] : vector<8x8xf32> to vector<8xf32>
    %58 = vector.shape_cast %57 : vector<8xf32> to vector<8x1xf32>
    %59 = tpu.reciprocal %58 {approx = true} : vector<8x1xf32> -> vector<8x1xf32>
    %60 = vector.broadcast %59 : vector<8x1xf32> to vector<8x8xf32>
    %61 = arith.mulf %56, %60 : vector<8x8xf32>
    %cst_22 = arith.constant dense<0.000000e+00> : vector<8x8xf32>
    %62 = tpu.matmul %61, %48, %cst_22 {dimension_numbers = #tpu.dot_dimension_numbers<[1], [0], [0], [1], [0, 0, 1, 1], [], []>} : vector<8x8xf32>, vector<8x8xf32>, vector<8x8xf32> -> vector<8x8xf32>
    %63 = vector.extract_strided_slice %26 {offsets = [0, 16], sizes = [8, 8], strides = [1, 1]} : vector<8x32xf32> to vector<8x8xf32>
    %64 = vector.extract_strided_slice %27 {offsets = [0, 16], sizes = [8, 8], strides = [1, 1]} : vector<8x32xf32> to vector<8x8xf32>
    %65 = vector.extract_strided_slice %28 {offsets = [0, 16], sizes = [8, 8], strides = [1, 1]} : vector<8x32xf32> to vector<8x8xf32>
    %cst_23 = arith.constant dense<0.000000e+00> : vector<8x8xf32>
    %66 = tpu.matmul %63, %64, %cst_23 {dimension_numbers = #tpu.dot_dimension_numbers<[1], [1], [0], [0], [0, 0, 1, 0], [], []>} : vector<8x8xf32>, vector<8x8xf32>, vector<8x8xf32> -> vector<8x8xf32>
    %cst_24 = arith.constant 0.353553385 : f32
    %67 = vector.broadcast %cst_24 : f32 to vector<8x8xf32>
    %68 = arith.mulf %66, %67 : vector<8x8xf32>
    %cst_25 = arith.constant dense<0xFF800000> : vector<8xf32>
    %69 = vector.multi_reduction <maximumf>, %68, %cst_25 [1] : vector<8x8xf32> to vector<8xf32>
    %70 = vector.shape_cast %69 : vector<8xf32> to vector<8x1xf32>
    %71 = vector.broadcast %70 : vector<8x1xf32> to vector<8x8xf32>
    %72 = arith.subf %68, %71 : vector<8x8xf32>
    %73 = math.exp %72 : vector<8x8xf32>
    %cst_26 = arith.constant dense<0.000000e+00> : vector<8xf32>
    %74 = vector.multi_reduction <add>, %73, %cst_26 [1] : vector<8x8xf32> to vector<8xf32>
    %75 = vector.shape_cast %74 : vector<8xf32> to vector<8x1xf32>
    %76 = tpu.reciprocal %75 {approx = true} : vector<8x1xf32> -> vector<8x1xf32>
    %77 = vector.broadcast %76 : vector<8x1xf32> to vector<8x8xf32>
    %78 = arith.mulf %73, %77 : vector<8x8xf32>
    %cst_27 = arith.constant dense<0.000000e+00> : vector<8x8xf32>
    %79 = tpu.matmul %78, %65, %cst_27 {dimension_numbers = #tpu.dot_dimension_numbers<[1], [0], [0], [1], [0, 0, 1, 1], [], []>} : vector<8x8xf32>, vector<8x8xf32>, vector<8x8xf32> -> vector<8x8xf32>
    %80 = vector.extract_strided_slice %26 {offsets = [0, 24], sizes = [8, 8], strides = [1, 1]} : vector<8x32xf32> to vector<8x8xf32>
    %81 = vector.extract_strided_slice %27 {offsets = [0, 24], sizes = [8, 8], strides = [1, 1]} : vector<8x32xf32> to vector<8x8xf32>
    %82 = vector.extract_strided_slice %28 {offsets = [0, 24], sizes = [8, 8], strides = [1, 1]} : vector<8x32xf32> to vector<8x8xf32>
    %cst_28 = arith.constant dense<0.000000e+00> : vector<8x8xf32>
    %83 = tpu.matmul %80, %81, %cst_28 {dimension_numbers = #tpu.dot_dimension_numbers<[1], [1], [0], [0], [0, 0, 1, 0], [], []>} : vector<8x8xf32>, vector<8x8xf32>, vector<8x8xf32> -> vector<8x8xf32>
    %cst_29 = arith.constant 0.353553385 : f32
    %84 = vector.broadcast %cst_29 : f32 to vector<8x8xf32>
    %85 = arith.mulf %83, %84 : vector<8x8xf32>
    %cst_30 = arith.constant dense<0xFF800000> : vector<8xf32>
    %86 = vector.multi_reduction <maximumf>, %85, %cst_30 [1] : vector<8x8xf32> to vector<8xf32>
    %87 = vector.shape_cast %86 : vector<8xf32> to vector<8x1xf32>
    %88 = vector.broadcast %87 : vector<8x1xf32> to vector<8x8xf32>
    %89 = arith.subf %85, %88 : vector<8x8xf32>
    %90 = math.exp %89 : vector<8x8xf32>
    %cst_31 = arith.constant dense<0.000000e+00> : vector<8xf32>
    %91 = vector.multi_reduction <add>, %90, %cst_31 [1] : vector<8x8xf32> to vector<8xf32>
    %92 = vector.shape_cast %91 : vector<8xf32> to vector<8x1xf32>
    %93 = tpu.reciprocal %92 {approx = true} : vector<8x1xf32> -> vector<8x1xf32>
    %94 = vector.broadcast %93 : vector<8x1xf32> to vector<8x8xf32>
    %95 = arith.mulf %90, %94 : vector<8x8xf32>
    %cst_32 = arith.constant dense<0.000000e+00> : vector<8x8xf32>
    %96 = tpu.matmul %95, %82, %cst_32 {dimension_numbers = #tpu.dot_dimension_numbers<[1], [0], [0], [1], [0, 0, 1, 1], [], []>} : vector<8x8xf32>, vector<8x8xf32>, vector<8x8xf32> -> vector<8x8xf32>
    %97 = tpu.concatenate %45, %62, %79, %96 in 1 : vector<8x8xf32>, vector<8x8xf32>, vector<8x8xf32>, vector<8x8xf32> -> vector<8x32xf32>
    %c0_33 = arith.constant 0 : index
    %c0_34 = arith.constant 0 : index
    %98 = vector.load %arg5[%c0_33, %c0_34] : memref<32x32xf32, #tpu.memory_space<vmem>>, vector<32x32xf32>
    %cst_35 = arith.constant dense<0.000000e+00> : vector<8x32xf32>
    %99 = tpu.matmul %97, %98, %cst_35 {dimension_numbers = #tpu.dot_dimension_numbers<[1], [0], [0], [1], [0, 0, 1, 1], [], []>} : vector<8x32xf32>, vector<32x32xf32>, vector<8x32xf32> -> vector<8x32xf32>
    %c0_36 = arith.constant 0 : index
    %c0_37 = arith.constant 0 : index
    %100 = vector.load %arg6[%c0_36, %c0_37] : memref<1x32xf32, #tpu.memory_space<vmem>>, vector<1x32xf32>
    %101 = vector.broadcast %100 : vector<1x32xf32> to vector<8x32xf32>
    %102 = arith.addf %99, %101 : vector<8x32xf32>
    %103 = arith.addf %1, %102 : vector<8x32xf32>
    %c0_38 = arith.constant 0 : index
    %c0_39 = arith.constant 0 : index
    %c0_40 = arith.constant 0 : index
    %104 = vector.load %arg7[%c0_38, %c0_39, %c0_40] : memref<1x8x32xf32, #tpu.memory_space<vmem>>, vector<1x8x32xf32>
    %105 = vector.shape_cast %104 : vector<1x8x32xf32> to vector<8x32xf32>
    %106 = vector.shape_cast %103 : vector<8x32xf32> to vector<1x8x32xf32>
    tpu.vector_store %arg7[%c0_38, %c0_39, %c0_40], %106 {strides = array<i32>} : memref<1x8x32xf32, #tpu.memory_space<vmem>>, vector<1x8x32xf32>,
    return
  }
  func.func @transform_0(%arg0: i32) -> (i32, i32, i32) {
    %c0_i32 = arith.constant 0 : i32
    %c0_i32_0 = arith.constant 0 : i32
    %c0_i32_1 = arith.constant 0 : i32
    return %arg0, %c0_i32, %c0_i32_0 : i32, i32, i32
  }
  func.func @transform_1(%arg0: i32) -> (i32, i32) {
    %c0_i32 = arith.constant 0 : i32
    %c0_i32_0 = arith.constant 0 : i32
    %c0_i32_1 = arith.constant 0 : i32
    return %c0_i32, %c0_i32_0 : i32, i32
  }
  func.func @transform_2(%arg0: i32) -> (i32, i32) {
    %c0_i32 = arith.constant 0 : i32
    %c0_i32_0 = arith.constant 0 : i32
    %c0_i32_1 = arith.constant 0 : i32
    return %c0_i32, %c0_i32_0 : i32, i32
  }
  func.func @transform_3(%arg0: i32) -> (i32, i32) {
    %c0_i32 = arith.constant 0 : i32
    %c0_i32_0 = arith.constant 0 : i32
    %c0_i32_1 = arith.constant 0 : i32
    return %c0_i32, %c0_i32_0 : i32, i32
  }
  func.func @transform_4(%arg0: i32) -> (i32, i32) {
    %c0_i32 = arith.constant 0 : i32
    %c0_i32_0 = arith.constant 0 : i32
    %c0_i32_1 = arith.constant 0 : i32
    return %c0_i32, %c0_i32_0 : i32, i32
  }
  func.func @transform_5(%arg0: i32) -> (i32, i32) {
    %c0_i32 = arith.constant 0 : i32
    %c0_i32_0 = arith.constant 0 : i32
    %c0_i32_1 = arith.constant 0 : i32
    return %c0_i32, %c0_i32_0 : i32, i32
  }
  func.func @transform_6(%arg0: i32) -> (i32, i32, i32) {
    %c0_i32 = arith.constant 0 : i32
    %c0_i32_0 = arith.constant 0 : i32
    %c0_i32_1 = arith.constant 0 : i32
    return %arg0, %c0_i32, %c0_i32_0 : i32, i32, i32
  }
}

module attributes {stable_mosaic.version = 11 : i64} {
  func.func @_self_attn_kernel(%arg0: i32, %arg1: memref<1x8x32xf32, #tpu.memory_space<vmem>>, %arg2: memref<1x32xf32, #tpu.memory_space<vmem>>, %arg3: memref<1x32xf32, #tpu.memory_space<vmem>>, %arg4: memref<32x96xf32, #tpu.memory_space<vmem>>, %arg5: memref<32x32xf32, #tpu.memory_space<vmem>>, %arg6: memref<1x32xf32, #tpu.memory_space<vmem>>, %arg7: memref<1x8x32xf32, #tpu.memory_space<vmem>>, %arg8: memref<1x8x32xf32, #tpu.memory_space<vmem>>) attributes {dimension_semantics = [#tpu.dimension_semantics<parallel>], iteration_bounds = array<i64: 2>, scalar_prefetch = 0 : i64, scratch_operands = 0 : i64, tpu.core_type = #tpu.core_type<tc>, window_params = [{transform_indices = @transform_0, window_bounds = array<i64: 1, 8, 32>}, {pipeline_mode = #tpu.pipeline_mode<synchronous>, transform_indices = @transform_1, window_bounds = array<i64: 1, 32>}, {pipeline_mode = #tpu.pipeline_mode<synchronous>, transform_indices = @transform_2, window_bounds = array<i64: 1, 32>}, {pipeline_mode = #tpu.pipeline_mode<synchronous>, transform_indices = @transform_3, window_bounds = array<i64: 32, 96>}, {pipeline_mode = #tpu.pipeline_mode<synchronous>, transform_indices = @transform_4, window_bounds = array<i64: 32, 32>}, {pipeline_mode = #tpu.pipeline_mode<synchronous>, transform_indices = @transform_5, window_bounds = array<i64: 1, 32>}, {transform_indices = @transform_6, window_bounds = array<i64: 1, 8, 32>}, {transform_indices = @transform_7, window_bounds = array<i64: 1, 8, 32>}]} {
    %c0 = arith.constant 0 : index
    %c0_0 = arith.constant 0 : index
    %c0_1 = arith.constant 0 : index
    %0 = vector.load %arg1[%c0, %c0_0, %c0_1] : memref<1x8x32xf32, #tpu.memory_space<vmem>>, vector<1x8x32xf32>
    %1 = vector.shape_cast %0 : vector<1x8x32xf32> to vector<8x32xf32>
    %c0_2 = arith.constant 0 : index
    %c0_3 = arith.constant 0 : index
    %2 = vector.load %arg2[%c0_2, %c0_3] : memref<1x32xf32, #tpu.memory_space<vmem>>, vector<1x32xf32>
    %c0_4 = arith.constant 0 : index
    %c0_5 = arith.constant 0 : index
    %3 = vector.load %arg3[%c0_4, %c0_5] : memref<1x32xf32, #tpu.memory_space<vmem>>, vector<1x32xf32>
    %cst = arith.constant dense<0.000000e+00> : vector<8xf32>
    %4 = vector.multi_reduction <add>, %1, %cst [1] : vector<8x32xf32> to vector<8xf32>
    %5 = vector.shape_cast %4 : vector<8xf32> to vector<8x1xf32>
    %cst_6 = arith.constant 3.200000e+01 : f32
    %6 = vector.broadcast %cst_6 : f32 to vector<8x1xf32>
    %7 = arith.divf %5, %6 : vector<8x1xf32>
    %8 = vector.broadcast %7 : vector<8x1xf32> to vector<8x32xf32>
    %9 = arith.subf %1, %8 : vector<8x32xf32>
    %10 = arith.mulf %9, %9 : vector<8x32xf32>
    %cst_7 = arith.constant dense<0.000000e+00> : vector<8xf32>
    %11 = vector.multi_reduction <add>, %10, %cst_7 [1] : vector<8x32xf32> to vector<8xf32>
    %12 = vector.shape_cast %11 : vector<8xf32> to vector<8x1xf32>
    %cst_8 = arith.constant 3.200000e+01 : f32
    %13 = vector.broadcast %cst_8 : f32 to vector<8x1xf32>
    %14 = arith.divf %12, %13 : vector<8x1xf32>
    %cst_9 = arith.constant 9.99999974E-6 : f32
    %15 = vector.broadcast %cst_9 : f32 to vector<8x1xf32>
    %16 = arith.addf %14, %15 : vector<8x1xf32>
    %17 = math.rsqrt %16 : vector<8x1xf32>
    %18 = vector.broadcast %17 : vector<8x1xf32> to vector<8x32xf32>
    %19 = arith.mulf %9, %18 : vector<8x32xf32>
    %20 = vector.broadcast %2 : vector<1x32xf32> to vector<8x32xf32>
    %21 = arith.mulf %19, %20 : vector<8x32xf32>
    %22 = vector.broadcast %3 : vector<1x32xf32> to vector<8x32xf32>
    %23 = arith.addf %21, %22 : vector<8x32xf32>
    %c0_10 = arith.constant 0 : index
    %c0_11 = arith.constant 0 : index
    %24 = vector.load %arg4[%c0_10, %c0_11] : memref<32x96xf32, #tpu.memory_space<vmem>>, vector<32x96xf32>
    %cst_12 = arith.constant dense<0.000000e+00> : vector<8x96xf32>
    %25 = tpu.matmul %23, %24, %cst_12 {dimension_numbers = #tpu.dot_dimension_numbers<[1], [0], [0], [1], [0, 0, 1, 1], [], []>} : vector<8x32xf32>, vector<32x96xf32>, vector<8x96xf32> -> vector<8x96xf32>
    %26 = vector.extract_strided_slice %25 {offsets = [0, 0], sizes = [8, 32], strides = [1, 1]} : vector<8x96xf32> to vector<8x32xf32>
    %27 = vector.extract_strided_slice %25 {offsets = [0, 32], sizes = [8, 32], strides = [1, 1]} : vector<8x96xf32> to vector<8x32xf32>
    %28 = vector.extract_strided_slice %25 {offsets = [0, 64], sizes = [8, 32], strides = [1, 1]} : vector<8x96xf32> to vector<8x32xf32>
    %29 = vector.extract_strided_slice %26 {offsets = [0, 0], sizes = [8, 8], strides = [1, 1]} : vector<8x32xf32> to vector<8x8xf32>
    %30 = vector.extract_strided_slice %27 {offsets = [0, 0], sizes = [8, 8], strides = [1, 1]} : vector<8x32xf32> to vector<8x8xf32>
    %31 = vector.extract_strided_slice %28 {offsets = [0, 0], sizes = [8, 8], strides = [1, 1]} : vector<8x32xf32> to vector<8x8xf32>
    %cst_13 = arith.constant dense<0.000000e+00> : vector<8x8xf32>
    %32 = tpu.matmul %29, %30, %cst_13 {dimension_numbers = #tpu.dot_dimension_numbers<[1], [1], [0], [0], [0, 0, 1, 0], [], []>} : vector<8x8xf32>, vector<8x8xf32>, vector<8x8xf32> -> vector<8x8xf32>
    %cst_14 = arith.constant 0.353553385 : f32
    %33 = vector.broadcast %cst_14 : f32 to vector<8x8xf32>
    %34 = arith.mulf %32, %33 : vector<8x8xf32>
    %cst_15 = arith.constant dense<0xFF800000> : vector<8xf32>
    %35 = vector.multi_reduction <maximumf>, %34, %cst_15 [1] : vector<8x8xf32> to vector<8xf32>
    %36 = vector.shape_cast %35 : vector<8xf32> to vector<8x1xf32>
    %37 = vector.broadcast %36 : vector<8x1xf32> to vector<8x8xf32>
    %38 = arith.subf %34, %37 : vector<8x8xf32>
    %39 = math.exp %38 : vector<8x8xf32>
    %cst_16 = arith.constant dense<0.000000e+00> : vector<8xf32>
    %40 = vector.multi_reduction <add>, %39, %cst_16 [1] : vector<8x8xf32> to vector<8xf32>
    %41 = vector.shape_cast %40 : vector<8xf32> to vector<8x1xf32>
    %42 = tpu.reciprocal %41 {approx = true} : vector<8x1xf32> -> vector<8x1xf32>
    %43 = vector.broadcast %42 : vector<8x1xf32> to vector<8x8xf32>
    %44 = arith.mulf %39, %43 : vector<8x8xf32>
    %cst_17 = arith.constant dense<0.000000e+00> : vector<8x8xf32>
    %45 = tpu.matmul %44, %31, %cst_17 {dimension_numbers = #tpu.dot_dimension_numbers<[1], [0], [0], [1], [0, 0, 1, 1], [], []>} : vector<8x8xf32>, vector<8x8xf32>, vector<8x8xf32> -> vector<8x8xf32>
    %46 = vector.extract_strided_slice %26 {offsets = [0, 8], sizes = [8, 8], strides = [1, 1]} : vector<8x32xf32> to vector<8x8xf32>
    %47 = vector.extract_strided_slice %27 {offsets = [0, 8], sizes = [8, 8], strides = [1, 1]} : vector<8x32xf32> to vector<8x8xf32>
    %48 = vector.extract_strided_slice %28 {offsets = [0, 8], sizes = [8, 8], strides = [1, 1]} : vector<8x32xf32> to vector<8x8xf32>
    %cst_18 = arith.constant dense<0.000000e+00> : vector<8x8xf32>
    %49 = tpu.matmul %46, %47, %cst_18 {dimension_numbers = #tpu.dot_dimension_numbers<[1], [1], [0], [0], [0, 0, 1, 0], [], []>} : vector<8x8xf32>, vector<8x8xf32>, vector<8x8xf32> -> vector<8x8xf32>
    %cst_19 = arith.constant 0.353553385 : f32
    %50 = vector.broadcast %cst_19 : f32 to vector<8x8xf32>
    %51 = arith.mulf %49, %50 : vector<8x8xf32>
    %cst_20 = arith.constant dense<0xFF800000> : vector<8xf32>
    %52 = vector.multi_reduction <maximumf>, %51, %cst_20 [1] : vector<8x8xf32> to vector<8xf32>
    %53 = vector.shape_cast %52 : vector<8xf32> to vector<8x1xf32>
    %54 = vector.broadcast %53 : vector<8x1xf32> to vector<8x8xf32>
    %55 = arith.subf %51, %54 : vector<8x8xf32>
    %56 = math.exp %55 : vector<8x8xf32>
    %cst_21 = arith.constant dense<0.000000e+00> : vector<8xf32>
    %57 = vector.multi_reduction <add>, %56, %cst_21 [1] : vector<8x8xf32> to vector<8xf32>
    %58 = vector.shape_cast %57 : vector<8xf32> to vector<8x1xf32>
    %59 = tpu.reciprocal %58 {approx = true} : vector<8x1xf32> -> vector<8x1xf32>
    %60 = vector.broadcast %59 : vector<8x1xf32> to vector<8x8xf32>
    %61 = arith.mulf %56, %60 : vector<8x8xf32>
    %cst_22 = arith.constant dense<0.000000e+00> : vector<8x8xf32>
    %62 = tpu.matmul %61, %48, %cst_22 {dimension_numbers = #tpu.dot_dimension_numbers<[1], [0], [0], [1], [0, 0, 1, 1], [], []>} : vector<8x8xf32>, vector<8x8xf32>, vector<8x8xf32> -> vector<8x8xf32>
    %63 = vector.extract_strided_slice %26 {offsets = [0, 16], sizes = [8, 8], strides = [1, 1]} : vector<8x32xf32> to vector<8x8xf32>
    %64 = vector.extract_strided_slice %27 {offsets = [0, 16], sizes = [8, 8], strides = [1, 1]} : vector<8x32xf32> to vector<8x8xf32>
    %65 = vector.extract_strided_slice %28 {offsets = [0, 16], sizes = [8, 8], strides = [1, 1]} : vector<8x32xf32> to vector<8x8xf32>
    %cst_23 = arith.constant dense<0.000000e+00> : vector<8x8xf32>
    %66 = tpu.matmul %63, %64, %cst_23 {dimension_numbers = #tpu.dot_dimension_numbers<[1], [1], [0], [0], [0, 0, 1, 0], [], []>} : vector<8x8xf32>, vector<8x8xf32>, vector<8x8xf32> -> vector<8x8xf32>
    %cst_24 = arith.constant 0.353553385 : f32
    %67 = vector.broadcast %cst_24 : f32 to vector<8x8xf32>
    %68 = arith.mulf %66, %67 : vector<8x8xf32>
    %cst_25 = arith.constant dense<0xFF800000> : vector<8xf32>
    %69 = vector.multi_reduction <maximumf>, %68, %cst_25 [1] : vector<8x8xf32> to vector<8xf32>
    %70 = vector.shape_cast %69 : vector<8xf32> to vector<8x1xf32>
    %71 = vector.broadcast %70 : vector<8x1xf32> to vector<8x8xf32>
    %72 = arith.subf %68, %71 : vector<8x8xf32>
    %73 = math.exp %72 : vector<8x8xf32>
    %cst_26 = arith.constant dense<0.000000e+00> : vector<8xf32>
    %74 = vector.multi_reduction <add>, %73, %cst_26 [1] : vector<8x8xf32> to vector<8xf32>
    %75 = vector.shape_cast %74 : vector<8xf32> to vector<8x1xf32>
    %76 = tpu.reciprocal %75 {approx = true} : vector<8x1xf32> -> vector<8x1xf32>
    %77 = vector.broadcast %76 : vector<8x1xf32> to vector<8x8xf32>
    %78 = arith.mulf %73, %77 : vector<8x8xf32>
    %cst_27 = arith.constant dense<0.000000e+00> : vector<8x8xf32>
    %79 = tpu.matmul %78, %65, %cst_27 {dimension_numbers = #tpu.dot_dimension_numbers<[1], [0], [0], [1], [0, 0, 1, 1], [], []>} : vector<8x8xf32>, vector<8x8xf32>, vector<8x8xf32> -> vector<8x8xf32>
    %80 = vector.extract_strided_slice %26 {offsets = [0, 24], sizes = [8, 8], strides = [1, 1]} : vector<8x32xf32> to vector<8x8xf32>
    %81 = vector.extract_strided_slice %27 {offsets = [0, 24], sizes = [8, 8], strides = [1, 1]} : vector<8x32xf32> to vector<8x8xf32>
    %82 = vector.extract_strided_slice %28 {offsets = [0, 24], sizes = [8, 8], strides = [1, 1]} : vector<8x32xf32> to vector<8x8xf32>
    %cst_28 = arith.constant dense<0.000000e+00> : vector<8x8xf32>
    %83 = tpu.matmul %80, %81, %cst_28 {dimension_numbers = #tpu.dot_dimension_numbers<[1], [1], [0], [0], [0, 0, 1, 0], [], []>} : vector<8x8xf32>, vector<8x8xf32>, vector<8x8xf32> -> vector<8x8xf32>
    %cst_29 = arith.constant 0.353553385 : f32
    %84 = vector.broadcast %cst_29 : f32 to vector<8x8xf32>
    %85 = arith.mulf %83, %84 : vector<8x8xf32>
    %cst_30 = arith.constant dense<0xFF800000> : vector<8xf32>
    %86 = vector.multi_reduction <maximumf>, %85, %cst_30 [1] : vector<8x8xf32> to vector<8xf32>
    %87 = vector.shape_cast %86 : vector<8xf32> to vector<8x1xf32>
    %88 = vector.broadcast %87 : vector<8x1xf32> to vector<8x8xf32>
    %89 = arith.subf %85, %88 : vector<8x8xf32>
    %90 = math.exp %89 : vector<8x8xf32>
    %cst_31 = arith.constant dense<0.000000e+00> : vector<8xf32>
    %91 = vector.multi_reduction <add>, %90, %cst_31 [1] : vector<8x8xf32> to vector<8xf32>
    %92 = vector.shape_cast %91 : vector<8xf32> to vector<8x1xf32>
    %93 = tpu.reciprocal %92 {approx = true} : vector<8x1xf32> -> vector<8x1xf32>
    %94 = vector.broadcast %93 : vector<8x1xf32> to vector<8x8xf32>
    %95 = arith.mulf %90, %94 : vector<8x8xf32>
    %cst_32 = arith.constant dense<0.000000e+00> : vector<8x8xf32>
    %96 = tpu.matmul %95, %82, %cst_32 {dimension_numbers = #tpu.dot_dimension_numbers<[1], [0], [0], [1], [0, 0, 1, 1], [], []>} : vector<8x8xf32>, vector<8x8xf32>, vector<8x8xf32> -> vector<8x8xf32>
    %97 = tpu.concatenate %45, %62, %79, %96 in 1 : vector<8x8xf32>, vector<8x8xf32>, vector<8x8xf32>, vector<8x8xf32> -> vector<8x32xf32>
    %c0_33 = arith.constant 0 : index
    %c0_34 = arith.constant 0 : index
    %98 = vector.load %arg5[%c0_33, %c0_34] : memref<32x32xf32, #tpu.memory_space<vmem>>, vector<32x32xf32>
    %cst_35 = arith.constant dense<0.000000e+00> : vector<8x32xf32>
    %99 = tpu.matmul %97, %98, %cst_35 {dimension_numbers = #tpu.dot_dimension_numbers<[1], [0], [0], [1], [0, 0, 1, 1], [], []>} : vector<8x32xf32>, vector<32x32xf32>, vector<8x32xf32> -> vector<8x32xf32>
    %c0_36 = arith.constant 0 : index
    %c0_37 = arith.constant 0 : index
    %100 = vector.load %arg6[%c0_36, %c0_37] : memref<1x32xf32, #tpu.memory_space<vmem>>, vector<1x32xf32>
    %101 = vector.broadcast %100 : vector<1x32xf32> to vector<8x32xf32>
    %102 = arith.addf %99, %101 : vector<8x32xf32>
    %c0_38 = arith.constant 0 : index
    %c0_39 = arith.constant 0 : index
    %c0_40 = arith.constant 0 : index
    %103 = vector.load %arg7[%c0_38, %c0_39, %c0_40] : memref<1x8x32xf32, #tpu.memory_space<vmem>>, vector<1x8x32xf32>
    %104 = vector.shape_cast %103 : vector<1x8x32xf32> to vector<8x32xf32>
    %105 = vector.shape_cast %102 : vector<8x32xf32> to vector<1x8x32xf32>
    tpu.vector_store %arg7[%c0_38, %c0_39, %c0_40], %105 {strides = array<i32>} : memref<1x8x32xf32, #tpu.memory_space<vmem>>, vector<1x8x32xf32>,
    %106 = arith.addf %1, %102 : vector<8x32xf32>
    %c0_41 = arith.constant 0 : index
    %c0_42 = arith.constant 0 : index
    %c0_43 = arith.constant 0 : index
    %107 = vector.load %arg8[%c0_41, %c0_42, %c0_43] : memref<1x8x32xf32, #tpu.memory_space<vmem>>, vector<1x8x32xf32>
    %108 = vector.shape_cast %107 : vector<1x8x32xf32> to vector<8x32xf32>
    %109 = vector.shape_cast %106 : vector<8x32xf32> to vector<1x8x32xf32>
    tpu.vector_store %arg8[%c0_41, %c0_42, %c0_43], %109 {strides = array<i32>} : memref<1x8x32xf32, #tpu.memory_space<vmem>>, vector<1x8x32xf32>,
    return
  }
  func.func @transform_0(%arg0: i32) -> (i32, i32, i32) {
    %c0_i32 = arith.constant 0 : i32
    %c0_i32_0 = arith.constant 0 : i32
    %c0_i32_1 = arith.constant 0 : i32
    return %arg0, %c0_i32, %c0_i32_0 : i32, i32, i32
  }
  func.func @transform_1(%arg0: i32) -> (i32, i32) {
    %c0_i32 = arith.constant 0 : i32
    %c0_i32_0 = arith.constant 0 : i32
    %c0_i32_1 = arith.constant 0 : i32
    return %c0_i32, %c0_i32_0 : i32, i32
  }
  func.func @transform_2(%arg0: i32) -> (i32, i32) {
    %c0_i32 = arith.constant 0 : i32
    %c0_i32_0 = arith.constant 0 : i32
    %c0_i32_1 = arith.constant 0 : i32
    return %c0_i32, %c0_i32_0 : i32, i32
  }
  func.func @transform_3(%arg0: i32) -> (i32, i32) {
    %c0_i32 = arith.constant 0 : i32
    %c0_i32_0 = arith.constant 0 : i32
    %c0_i32_1 = arith.constant 0 : i32
    return %c0_i32, %c0_i32_0 : i32, i32
  }
  func.func @transform_4(%arg0: i32) -> (i32, i32) {
    %c0_i32 = arith.constant 0 : i32
    %c0_i32_0 = arith.constant 0 : i32
    %c0_i32_1 = arith.constant 0 : i32
    return %c0_i32, %c0_i32_0 : i32, i32
  }
  func.func @transform_5(%arg0: i32) -> (i32, i32) {
    %c0_i32 = arith.constant 0 : i32
    %c0_i32_0 = arith.constant 0 : i32
    %c0_i32_1 = arith.constant 0 : i32
    return %c0_i32, %c0_i32_0 : i32, i32
  }
  func.func @transform_6(%arg0: i32) -> (i32, i32, i32) {
    %c0_i32 = arith.constant 0 : i32
    %c0_i32_0 = arith.constant 0 : i32
    %c0_i32_1 = arith.constant 0 : i32
    return %arg0, %c0_i32, %c0_i32_0 : i32, i32, i32
  }
  func.func @transform_7(%arg0: i32) -> (i32, i32, i32) {
    %c0_i32 = arith.constant 0 : i32
    %c0_i32_0 = arith.constant 0 : i32
    %c0_i32_1 = arith.constant 0 : i32
    return %arg0, %c0_i32, %c0_i32_0 : i32, i32, i32
  }
}

module attributes {stable_mosaic.version = 11 : i64} {
  func.func @_mlp_kernel(%arg0: i32, %arg1: memref<16x32xf32, #tpu.memory_space<vmem>>, %arg2: memref<1x32xf32, #tpu.memory_space<vmem>>, %arg3: memref<1x32xf32, #tpu.memory_space<vmem>>, %arg4: memref<32x128xf32, #tpu.memory_space<vmem>>, %arg5: memref<1x128xf32, #tpu.memory_space<vmem>>, %arg6: memref<128x32xf32, #tpu.memory_space<vmem>>, %arg7: memref<1x32xf32, #tpu.memory_space<vmem>>, %arg8: memref<16x32xf32, #tpu.memory_space<vmem>>) attributes {dimension_semantics = [#tpu.dimension_semantics<parallel>], iteration_bounds = array<i64: 1>, scalar_prefetch = 0 : i64, scratch_operands = 0 : i64, tpu.core_type = #tpu.core_type<tc>, window_params = [{transform_indices = @transform_0, window_bounds = array<i64: 16, 32>}, {pipeline_mode = #tpu.pipeline_mode<synchronous>, transform_indices = @transform_1, window_bounds = array<i64: 1, 32>}, {pipeline_mode = #tpu.pipeline_mode<synchronous>, transform_indices = @transform_2, window_bounds = array<i64: 1, 32>}, {pipeline_mode = #tpu.pipeline_mode<synchronous>, transform_indices = @transform_3, window_bounds = array<i64: 32, 128>}, {pipeline_mode = #tpu.pipeline_mode<synchronous>, transform_indices = @transform_4, window_bounds = array<i64: 1, 128>}, {pipeline_mode = #tpu.pipeline_mode<synchronous>, transform_indices = @transform_5, window_bounds = array<i64: 128, 32>}, {pipeline_mode = #tpu.pipeline_mode<synchronous>, transform_indices = @transform_6, window_bounds = array<i64: 1, 32>}, {transform_indices = @transform_7, window_bounds = array<i64: 16, 32>}]} {
    %c0 = arith.constant 0 : index
    %c0_0 = arith.constant 0 : index
    %0 = vector.load %arg1[%c0, %c0_0] : memref<16x32xf32, #tpu.memory_space<vmem>>, vector<16x32xf32>
    %c0_1 = arith.constant 0 : index
    %c0_2 = arith.constant 0 : index
    %1 = vector.load %arg2[%c0_1, %c0_2] : memref<1x32xf32, #tpu.memory_space<vmem>>, vector<1x32xf32>
    %c0_3 = arith.constant 0 : index
    %c0_4 = arith.constant 0 : index
    %2 = vector.load %arg3[%c0_3, %c0_4] : memref<1x32xf32, #tpu.memory_space<vmem>>, vector<1x32xf32>
    %cst = arith.constant dense<0.000000e+00> : vector<16xf32>
    %3 = vector.multi_reduction <add>, %0, %cst [1] : vector<16x32xf32> to vector<16xf32>
    %4 = vector.shape_cast %3 : vector<16xf32> to vector<16x1xf32>
    %cst_5 = arith.constant 3.200000e+01 : f32
    %5 = vector.broadcast %cst_5 : f32 to vector<16x1xf32>
    %6 = arith.divf %4, %5 : vector<16x1xf32>
    %7 = vector.broadcast %6 : vector<16x1xf32> to vector<16x32xf32>
    %8 = arith.subf %0, %7 : vector<16x32xf32>
    %9 = arith.mulf %8, %8 : vector<16x32xf32>
    %cst_6 = arith.constant dense<0.000000e+00> : vector<16xf32>
    %10 = vector.multi_reduction <add>, %9, %cst_6 [1] : vector<16x32xf32> to vector<16xf32>
    %11 = vector.shape_cast %10 : vector<16xf32> to vector<16x1xf32>
    %cst_7 = arith.constant 3.200000e+01 : f32
    %12 = vector.broadcast %cst_7 : f32 to vector<16x1xf32>
    %13 = arith.divf %11, %12 : vector<16x1xf32>
    %cst_8 = arith.constant 9.99999974E-6 : f32
    %14 = vector.broadcast %cst_8 : f32 to vector<16x1xf32>
    %15 = arith.addf %13, %14 : vector<16x1xf32>
    %16 = math.rsqrt %15 : vector<16x1xf32>
    %17 = vector.broadcast %16 : vector<16x1xf32> to vector<16x32xf32>
    %18 = arith.mulf %8, %17 : vector<16x32xf32>
    %19 = vector.broadcast %1 : vector<1x32xf32> to vector<16x32xf32>
    %20 = arith.mulf %18, %19 : vector<16x32xf32>
    %21 = vector.broadcast %2 : vector<1x32xf32> to vector<16x32xf32>
    %22 = arith.addf %20, %21 : vector<16x32xf32>
    %c0_9 = arith.constant 0 : index
    %c0_10 = arith.constant 0 : index
    %23 = vector.load %arg4[%c0_9, %c0_10] : memref<32x128xf32, #tpu.memory_space<vmem>>, vector<32x128xf32>
    %cst_11 = arith.constant dense<0.000000e+00> : vector<16x128xf32>
    %24 = tpu.matmul %22, %23, %cst_11 {dimension_numbers = #tpu.dot_dimension_numbers<[1], [0], [0], [1], [0, 0, 1, 1], [], []>} : vector<16x32xf32>, vector<32x128xf32>, vector<16x128xf32> -> vector<16x128xf32>
    %c0_12 = arith.constant 0 : index
    %c0_13 = arith.constant 0 : index
    %25 = vector.load %arg5[%c0_12, %c0_13] : memref<1x128xf32, #tpu.memory_space<vmem>>, vector<1x128xf32>
    %26 = vector.broadcast %25 : vector<1x128xf32> to vector<16x128xf32>
    %27 = arith.addf %24, %26 : vector<16x128xf32>
    %cst_14 = arith.constant 5.000000e-01 : f32
    %28 = vector.broadcast %cst_14 : f32 to vector<16x128xf32>
    %29 = arith.mulf %28, %27 : vector<16x128xf32>
    %cst_15 = arith.constant 0.707106769 : f32
    %30 = vector.broadcast %cst_15 : f32 to vector<16x128xf32>
    %31 = arith.mulf %27, %30 : vector<16x128xf32>
    %32 = math.absf %31 : vector<16x128xf32>
    %cst_16 = arith.constant 5.000000e-01 : f32
    %33 = vector.broadcast %cst_16 : f32 to vector<16x128xf32>
    %34 = arith.mulf %33, %32 : vector<16x128xf32>
    %cst_17 = arith.constant 1.000000e+00 : f32
    %35 = vector.broadcast %cst_17 : f32 to vector<16x128xf32>
    %36 = arith.addf %35, %34 : vector<16x128xf32>
    %cst_18 = arith.constant 1.000000e+00 : f32
    %37 = vector.broadcast %cst_18 : f32 to vector<16x128xf32>
    %38 = arith.divf %37, %36 : vector<16x128xf32>
    %cst_19 = arith.constant 0.170872763 : f32
    %39 = vector.broadcast %cst_19 : f32 to vector<16x128xf32>
    %40 = arith.mulf %38, %39 : vector<16x128xf32>
    %cst_20 = arith.constant -0.822152256 : f32
    %41 = vector.broadcast %cst_20 : f32 to vector<16x128xf32>
    %42 = arith.addf %41, %40 : vector<16x128xf32>
    %43 = arith.mulf %38, %42 : vector<16x128xf32>
    %cst_21 = arith.constant 1.48851585 : f32
    %44 = vector.broadcast %cst_21 : f32 to vector<16x128xf32>
    %45 = arith.addf %44, %43 : vector<16x128xf32>
    %46 = arith.mulf %38, %45 : vector<16x128xf32>
    %cst_22 = arith.constant -1.13520396 : f32
    %47 = vector.broadcast %cst_22 : f32 to vector<16x128xf32>
    %48 = arith.addf %47, %46 : vector<16x128xf32>
    %49 = arith.mulf %38, %48 : vector<16x128xf32>
    %cst_23 = arith.constant 0.278868079 : f32
    %50 = vector.broadcast %cst_23 : f32 to vector<16x128xf32>
    %51 = arith.addf %50, %49 : vector<16x128xf32>
    %52 = arith.mulf %38, %51 : vector<16x128xf32>
    %cst_24 = arith.constant -0.186288059 : f32
    %53 = vector.broadcast %cst_24 : f32 to vector<16x128xf32>
    %54 = arith.addf %53, %52 : vector<16x128xf32>
    %55 = arith.mulf %38, %54 : vector<16x128xf32>
    %cst_25 = arith.constant 0.0967841818 : f32
    %56 = vector.broadcast %cst_25 : f32 to vector<16x128xf32>
    %57 = arith.addf %56, %55 : vector<16x128xf32>
    %58 = arith.mulf %38, %57 : vector<16x128xf32>
    %cst_26 = arith.constant 0.374091953 : f32
    %59 = vector.broadcast %cst_26 : f32 to vector<16x128xf32>
    %60 = arith.addf %59, %58 : vector<16x128xf32>
    %61 = arith.mulf %38, %60 : vector<16x128xf32>
    %cst_27 = arith.constant 1.00002372 : f32
    %62 = vector.broadcast %cst_27 : f32 to vector<16x128xf32>
    %63 = arith.addf %62, %61 : vector<16x128xf32>
    %64 = arith.mulf %38, %63 : vector<16x128xf32>
    %cst_28 = arith.constant -1.26551223 : f32
    %65 = vector.broadcast %cst_28 : f32 to vector<16x128xf32>
    %66 = arith.addf %65, %64 : vector<16x128xf32>
    %cst_29 = arith.constant 0.000000e+00 : f32
    %67 = vector.broadcast %cst_29 : f32 to vector<16x128xf32>
    %68 = arith.subf %67, %32 : vector<16x128xf32>
    %69 = arith.mulf %68, %32 : vector<16x128xf32>
    %70 = arith.addf %69, %66 : vector<16x128xf32>
    %71 = math.exp %70 : vector<16x128xf32>
    %72 = arith.mulf %38, %71 : vector<16x128xf32>
    %cst_30 = arith.constant 1.000000e+00 : f32
    %73 = vector.broadcast %cst_30 : f32 to vector<16x128xf32>
    %74 = arith.subf %73, %72 : vector<16x128xf32>
    %cst_31 = arith.constant 0.000000e+00 : f32
    %75 = vector.broadcast %cst_31 : f32 to vector<16x128xf32>
    %76 = arith.cmpf oge, %31, %75 : vector<16x128xf32>
    %cst_32 = arith.constant 0.000000e+00 : f32
    %77 = vector.broadcast %cst_32 : f32 to vector<16x128xf32>
    %78 = arith.subf %77, %74 : vector<16x128xf32>
    %79 = arith.select %76, %74, %78 : vector<16x128xi1>, vector<16x128xf32>
    %cst_33 = arith.constant 1.000000e+00 : f32
    %80 = vector.broadcast %cst_33 : f32 to vector<16x128xf32>
    %81 = arith.addf %80, %79 : vector<16x128xf32>
    %82 = arith.mulf %29, %81 : vector<16x128xf32>
    %c0_34 = arith.constant 0 : index
    %c0_35 = arith.constant 0 : index
    %83 = vector.load %arg6[%c0_34, %c0_35] : memref<128x32xf32, #tpu.memory_space<vmem>>, vector<128x32xf32>
    %cst_36 = arith.constant dense<0.000000e+00> : vector<16x32xf32>
    %84 = tpu.matmul %82, %83, %cst_36 {dimension_numbers = #tpu.dot_dimension_numbers<[1], [0], [0], [1], [0, 0, 1, 1], [], []>} : vector<16x128xf32>, vector<128x32xf32>, vector<16x32xf32> -> vector<16x32xf32>
    %c0_37 = arith.constant 0 : index
    %c0_38 = arith.constant 0 : index
    %85 = vector.load %arg7[%c0_37, %c0_38] : memref<1x32xf32, #tpu.memory_space<vmem>>, vector<1x32xf32>
    %86 = vector.broadcast %85 : vector<1x32xf32> to vector<16x32xf32>
    %87 = arith.addf %84, %86 : vector<16x32xf32>
    %88 = arith.addf %0, %87 : vector<16x32xf32>
    %c0_39 = arith.constant 0 : index
    %c0_40 = arith.constant 0 : index
    %89 = vector.load %arg8[%c0_39, %c0_40] : memref<16x32xf32, #tpu.memory_space<vmem>>, vector<16x32xf32>
    tpu.vector_store %arg8[%c0_39, %c0_40], %88 {strides = array<i32>} : memref<16x32xf32, #tpu.memory_space<vmem>>, vector<16x32xf32>,
    return
  }
  func.func @transform_0(%arg0: i32) -> (i32, i32) {
    %c0_i32 = arith.constant 0 : i32
    %c0_i32_0 = arith.constant 0 : i32
    return %arg0, %c0_i32 : i32, i32
  }
  func.func @transform_1(%arg0: i32) -> (i32, i32) {
    %c0_i32 = arith.constant 0 : i32
    %c0_i32_0 = arith.constant 0 : i32
    %c0_i32_1 = arith.constant 0 : i32
    return %c0_i32, %c0_i32_0 : i32, i32
  }
  func.func @transform_2(%arg0: i32) -> (i32, i32) {
    %c0_i32 = arith.constant 0 : i32
    %c0_i32_0 = arith.constant 0 : i32
    %c0_i32_1 = arith.constant 0 : i32
    return %c0_i32, %c0_i32_0 : i32, i32
  }
  func.func @transform_3(%arg0: i32) -> (i32, i32) {
    %c0_i32 = arith.constant 0 : i32
    %c0_i32_0 = arith.constant 0 : i32
    %c0_i32_1 = arith.constant 0 : i32
    return %c0_i32, %c0_i32_0 : i32, i32
  }
  func.func @transform_4(%arg0: i32) -> (i32, i32) {
    %c0_i32 = arith.constant 0 : i32
    %c0_i32_0 = arith.constant 0 : i32
    %c0_i32_1 = arith.constant 0 : i32
    return %c0_i32, %c0_i32_0 : i32, i32
  }
  func.func @transform_5(%arg0: i32) -> (i32, i32) {
    %c0_i32 = arith.constant 0 : i32
    %c0_i32_0 = arith.constant 0 : i32
    %c0_i32_1 = arith.constant 0 : i32
    return %c0_i32, %c0_i32_0 : i32, i32
  }
  func.func @transform_6(%arg0: i32) -> (i32, i32) {
    %c0_i32 = arith.constant 0 : i32
    %c0_i32_0 = arith.constant 0 : i32
    %c0_i32_1 = arith.constant 0 : i32
    return %c0_i32, %c0_i32_0 : i32, i32
  }
  func.func @transform_7(%arg0: i32) -> (i32, i32) {
    %c0_i32 = arith.constant 0 : i32
    %c0_i32_0 = arith.constant 0 : i32
    return %arg0, %c0_i32 : i32, i32
  }
}

</mosaic_0001>

<bundles_post_ra>
// kernel: cross_block.8
= control target key start
LH: loop header
LB: loop body
LE: loop exit
PB: predicated region body
PF: predicated region fallthrough
CT: control target
= control target key end

     0   :  { %s1473_s21 = smov 0   ;;  %s1618_s0 = inlined_call_operand.vmem [shape: f32[2,8,32], index: 0, kind: input, shape index: {}]   ;;  %s1619_s1 = inlined_call_operand.vmem [shape: f32[2,8,32], index: 1, kind: input, shape index: {}]   ;;  %s1620_s2 = inlined_call_operand.vmem [shape: f32[32,32], index: 2, kind: input, shape index: {}]   ;;  %s1621_s3 = inlined_call_operand.vmem [shape: f32[32,64], index: 3, kind: input, shape index: {}]   ;;  %s1622_s4 = inlined_call_operand.vmem [shape: f32[32,32], index: 4, kind: input, shape index: {}]   ;;  %s1623_s5 = inlined_call_operand.vmem [shape: f32[1,32], index: 5, kind: input, shape index: {}]   ;;  %s1624_s6 = inlined_call_operand.vmem [shape: f32[2,8,32], index: 6, kind: output, shape index: {}]  }
   0x1 LB: > { %s1252_s22 = sadd.s32 4294967295, %s1424_s21   ;;  %p1256_p0 = scmp.ge.s32.totalorder %s1424_s21, 1  ;;  %s1424_s21 = sphi %s1473_s21, %s16_s21  }
   0x2   : > { %p220_p1 = scmp.lt.s32.totalorder %s1424_s21, 3 }
   0x4   : > { %p221_p2 = pnand %p1256_p0, %p220_p1 }
   0x5   : > { %p252_p3 = scmp.lt.s32.totalorder (!%p221_p2), %s1252_s22, 1  ;;  %s1428_s23 = smov (!%p221_p2), 112  }
   0x6   : > { %224 = sbr.rel (%p221_p2) target bundleno = 1355 (0x54b), region = 44  ;;  %s1429_s24 = smov (!%p221_p2), 120  }
   0x7   : > { %s1430_s25 = smov (!%p221_p2), 104   ;;  %s1431_s26 = smov (!%p221_p2), 96  }
   0x8   : > { %s1432_s27 = smov (!%p221_p2), 80   ;;  %s1433_s28 = smov (!%p221_p2), 72  }
   0x9   : > { %s1434_s29 = smov (!%p221_p2), 88   ;;  %s1435_s15 = smov (!%p221_p2), 8  }
   0xa   : > { %s1437_s17 = smov (!%p221_p2), 24  }
   0xb   : > { %v347_v0 = vld [vmem:[%s1621_s3 + $0x18] sm:$0xff]  ;;  %v1426_v2 = vmov 0.0   ;;  %v346_v3 = vld [vmem:[%s1621_s3 + $0x10] sm:$0xff]  ;;  %s1626_s22 = smov (!%p252_p3, %s1252_s22), 1  ;;  %v345_v5 = vld [vmem:[%s1621_s3 + $0x8] sm:$0xff]  ;;  %vm270_vm0 = vcmask 261120  }
   0xc   : > { %v269_v1 = vld [vmem:[%s1620_s2 + $0x18] sm:$0xff]  ;;  %1320 = vmatprep.subr.mxu1 %v1426_v2  ;;  %1309 = vmatprep.subr.mxu0 %v1426_v2  ;;  %v268_v4 = vld [vmem:[%s1620_s2 + $0x10] sm:$0xff]  ;;  %v267_v6 = vld [vmem:[%s1620_s2 + $0x8] sm:$0xff]  ;;  %s1503_s11 = sshll.u32 %s1626_s22, 3  ;;  %vm1427_vm1 = vmmov 0   ;;  %vm421_vm2 = vcmask 64512  }
   0xd   : > { %1321 = vmatpush3.msra.mxu1 %v347_v0  ;;  %1310 = vmatpush3.msra.mxu0 %v269_v1  ;;  %v344_v7 = vld [vmem:[%s1621_s3] sm:$0xff]  ;;  %s259_s16 = scalar_lea.vmem %s1619_s1, %s1503_s11  ;;  %s255_s22 = scalar_lea.vmem %s1618_s0, %s1503_s11  ;;  %vm1097_vm3 = vcmask 130048   ;;  %vm1099_vm4 = vcmask 195584  }
   0xe   : > { %1322 = vmatprep.subr.mxu1 %v1426_v2  ;;  %1311 = vmatprep.subr.mxu0 %v1426_v2  ;;  %v265_v8 = vld [vmem:[%s259_s16] sm:$0xff]  ;;  %s1436_s16 = smov 16  }
   0xf   : > { %1323 = vmatpush3.msra.mxu1 %v346_v3  ;;  %1312 = vmatpush3.msra.mxu0 %v268_v4  ;;  %v266_v9 = vld [vmem:[%s1620_s2] sm:$0xff] }
  0x10   : > { %1324 = vmatprep.subr.mxu1 %v1426_v2  ;;  %1313 = vmatprep.subr.mxu0 %v1426_v2  ;;  %v1525_v10 = vld [vmem:[%s255_s22] sm:$0xff] }
  0x11   : > { %1325 = vmatpush3.msra.mxu1 %v345_v5  ;;  %1314 = vmatpush3.msra.mxu0 %v267_v6 }
  0x12   : > { %1326 = vmatprep.subr.mxu1 %v1426_v2  ;;  %1328 = vmatprep.mubr.msk.f32.mxu1 %vm1427_vm1, %v1426_v2 }
  0x13   : > { %1327 = vmatpush3.msra.mxu1 %v344_v7  ;;  %1315 = vmatprep.subr.mxu0 %v1426_v2 }
  0x14   : > { %1329 = vmatmul.mubr.msk.f32.vlgmr.msra.gmra.mxu1 %vm270_vm0, %v265_v8  ;;  %1316 = vmatpush3.msra.mxu0 %v266_v9 }
  0x15   : > { %1317 = vmatprep.mubr.msk.f32.mxu0 %vm1427_vm1, %v1426_v2  ;;  %1331 = vmatprep.subr.mxu1 %v1426_v2 }
  0x16   : > { %1318 = vmatmul.mubr.msk.f32.vlgmr.msra.gmra.mxu0 %vm270_vm0, %v1525_v10  ;;  %1333 = vmatprep.mubr.msk.f32.mxu1 %vm1427_vm1, %v1426_v2 }
  0x17   : > { %1341 = vmatprep.subr.mxu0 %v1426_v2  ;;  %1343 = vmatprep.mubr.msk.f32.mxu0 %vm1427_vm1, %v1426_v2 }
  0xd4   : > { %v1538_v11 = vpop.f32.mrf.mxu1 }
  0xd5   : > { %754 = vrot.lane.b32.xlu1 %v1538_v11, %s1428_s23  ;;  %588 = vrot.lane.b32.xlu0 %v1538_v11, %s1429_s24 }
  0xd6   : > { %1332 = vmatpush3.xpose.msk.msra.mxu1 %vm421_vm2, %v1538_v11  ;;  %v340_v12 = vpop.f32.mrf.mxu0  ;;  %v1330_v13 = vpop.f32.mrf.mxu1 }
  0xd7   : > { %1336 = vmatprep.subr.mxu1 %v1426_v2  ;;  %v1104_v13 = vld [vmem:[%s1622_s4 + $0x18] sm:$0xff] }
  0xd8   : > { %v1319_v14 = vpop.f32.mrf.mxu0 }
  0xd9   : > { %1334 = vmatmul.mubr.msk.f32.vlgmr.msra.gmra.mxu1 %vm421_vm2, %v340_v12  ;;  %752 = vrot.lane.b32.xlu1 %v340_v12, %s1428_s23  ;;  %v1103_v14 = vld [vmem:[%s1622_s4 + $0x10] sm:$0xff]  ;;  %s263_s23 = scalar_lea.vmem %s1624_s6, %s1503_s11 }
  0xda   : > { %586 = vrot.lane.b32.xlu0 %v340_v12, %s1429_s24  ;;  %1338 = vmatprep.mubr.msk.f32.mxu1 %vm1427_vm1, %v1426_v2 }
  0xdd   : > { %918 = vrot.lane.b32.xlu1 %v340_v12, %s1430_s25 }
  0xde   : > { %920 = vrot.lane.b32.xlu0 %v1538_v11, %s1430_s25 }
 0x147   : > { %v589_v15 = vpop.permute.xlu0 %588  ;;  %v755_v16 = vpop.permute.xlu1 %754 }
 0x148   : > { %1342 = vmatpush3.xpose.msk.msra.mxu0 %vm421_vm2, %v589_v15  ;;  %v1102_v15 = vld [vmem:[%s1622_s4 + $0x8] sm:$0xff] }
 0x149   : > { %1351 = vmatprep.subr.mxu0 %v1426_v2 }
 0x14b   : > { %v753_v18 = vpop.permute.xlu1 %752 }
 0x14c   : > { %v587_v17 = vpop.permute.xlu0 %586 }
 0x14d   : > { %1344 = vmatmul.mubr.msk.f32.vlgmr.msra.gmra.mxu0 %vm421_vm2, %v587_v17 }
 0x14e   : > { %1352 = vmatpush3.xpose.msk.msra.mxu0 %vm421_vm2, %v755_v16  ;;  %1353 = vmatprep.mubr.msk.f32.mxu0 %vm1427_vm1, %v1426_v2  ;;  %v1101_v16 = vld [vmem:[%s1622_s4] sm:$0xff] }
 0x14f   : > { %1361 = vmatprep.subr.mxu0 %v1426_v2  ;;  %v919_v20 = vpop.permute.xlu1 %918 }
 0x150   : > { %v921_v19 = vpop.permute.xlu0 %920 }
 0x151   : > { %1354 = vmatmul.mubr.msk.f32.vlgmr.msra.gmra.mxu0 %vm421_vm2, %v753_v18 }
 0x152   : > { %1362 = vmatpush3.xpose.msk.msra.mxu0 %vm421_vm2, %v921_v19  ;;  %1363 = vmatprep.mubr.msk.f32.mxu0 %vm1427_vm1, %v1426_v2 }
 0x153   : > { %1371 = vmatprep.subr.mxu0 %v1426_v2 }
 0x155   : > { %1364 = vmatmul.mubr.msk.f32.vlgmr.msra.gmra.mxu0 %vm421_vm2, %v919_v20 }
 0x156   : > { %1379 = vmatprep.mubr.msk.f32.mxu0 %vm1427_vm1, %v1426_v2  ;;  %1372 = vmatpush3.msra.mxu0 %v1104_v13 }
 0x157   : > { %1373 = vmatprep.subr.mxu0 %v1426_v2 }
 0x158   : > { %1374 = vmatpush3.msra.mxu0 %v1103_v14 }
 0x159   : > { %1375 = vmatprep.subr.mxu0 %v1426_v2 }
 0x15a   : > { %1376 = vmatpush3.msra.mxu0 %v1102_v15 }
 0x15b   : > { %1377 = vmatprep.subr.mxu0 %v1426_v2 }
 0x15c   : > { %1378 = vmatpush3.msra.mxu0 %v1101_v16 }
 0x199   : > { %v494_v21 = vpop.f32.mrf.mxu1 }
 0x19a   : > { %v498_v22 = vmul.f32 0.35355338, %v494_v21 }
 0x19b   : > { %v1335_v23 = vpop.f32.mrf.mxu1 }
 0x19c   : > { %v499_v24 = vsel %vm421_vm2, %v498_v22, -inf }
 0x19d   : > { %500 = vmax.xlane.f32.xlu0 %v499_v24 }
 0x20d   : > { %v660_v25 = vpop.f32.mrf.mxu0 }
 0x20e   : > { %v664_v26 = vmul.f32 0.35355338, %v660_v25 }
 0x20f   : > { %v1345_v27 = vpop.f32.mrf.mxu0 }
 0x210   : > { %v665_v28 = vsel %vm421_vm2, %v664_v26, -inf }
 0x211   : > { %666 = vmax.xlane.f32.xlu1 %v665_v28  ;;  %v826_v29 = vpop.f32.mrf.mxu0  ;;  %v1274_v28 = vld [vmem:[%s1623_s5] ss:$0 sm:$0xff] }
 0x212   : > { %v830_v30 = vmul.f32 0.35355338, %v826_v29 }
 0x213   : > { %v1355_v31 = vpop.f32.mrf.mxu0 }
 0x214   : > { %v831_v32 = vsel %vm421_vm2, %v830_v30, -inf }
 0x215   : > { %832 = vmax.xlane.f32.xlu0 %v831_v32  ;;  %v992_v33 = vpop.f32.mrf.mxu0 }
 0x216   : > { %v996_v34 = vmul.f32 0.35355338, %v992_v33 }
 0x217   : > { %v1365_v35 = vpop.f32.mrf.mxu0 }
 0x218   : > { %v997_v36 = vsel %vm421_vm2, %v996_v34, -inf }
 0x219   : > { %998 = vmax.xlane.f32.xlu0 %v997_v36 }
 0x222   : > { %510 = vrot.lane.b32.xlu1 %v1538_v11, %s1431_s26 }
 0x226   : > { %v501_v37 = vpop.xlane.xlu0 %500 }
 0x227   : > { %v502_v38 = vsub.f32 %v498_v22, %v501_v37 }
 0x229   : > { %v503_v39 = vmul.f32 1.442695, %v502_v38 }
 0x22b   : > { %1402 = vpow2.f32 %v503_v39 }
 0x238   : > { %v1403_v40 = vpop.eup %1402 }
 0x239   : > { %v505_v41 = vsel %vm421_vm2, %v1403_v40, 0.0 }
 0x246   : > { %506 = vadd.xlane.f32.xlu1 %v505_v41 }
 0x29a   : > { %v667_v42 = vpop.xlane.xlu1 %666 }
 0x29b   : > { %v668_v43 = vsub.f32 %v664_v26, %v667_v42 }
 0x29d   : > { %v669_v44 = vmul.f32 1.442695, %v668_v43 }
 0x29e   : > { %v511_v45 = vpop.permute.xlu1 %510  ;;  %v833_v46 = vpop.xlane.xlu0 %832 }
 0x29f   : > { %1404 = vpow2.f32 %v669_v44  ;;  %v834_v47 = vsub.f32 %v830_v30, %v833_v46  ;;  %1337 = vmatpush3.msra.mxu1 %v511_v45 }
 0x2a0   : > { %1346 = vmatprep.subr.mxu1 %v1426_v2 }
 0x2a1   : > { %v835_v48 = vmul.f32 1.442695, %v834_v47 }
 0x2a2   : > { %v999_v49 = vpop.xlane.xlu0 %998 }
 0x2a3   : > { %1406 = vpow2.f32 %v835_v48  ;;  %v1000_v50 = vsub.f32 %v996_v34, %v999_v49 }
 0x2a5   : > { %v1001_v51 = vmul.f32 1.442695, %v1000_v50 }
 0x2a7   : > { %1408 = vpow2.f32 %v1001_v51 }
 0x2ac   : > { %v1405_v52 = vpop.eup %1404 }
 0x2ad   : > { %v671_v53 = vsel %vm421_vm2, %v1405_v52, 0.0 }
 0x2ae   : > { %672 = vadd.xlane.f32.xlu0 %v671_v53 }
 0x2b0   : > { %v1407_v54 = vpop.eup %1406 }
 0x2b1   : > { %v837_v55 = vsel %vm421_vm2, %v1407_v54, 0.0 }
 0x2b2   : > { %838 = vadd.xlane.f32.xlu1 %v837_v55 }
 0x2b4   : > { %v1409_v56 = vpop.eup %1408 }
 0x2b5   : > { %v1003_v57 = vsel %vm421_vm2, %v1409_v56, 0.0 }
 0x2b6   : > { %1004 = vadd.xlane.f32.xlu0 %v1003_v57 }
 0x2c3   : > { %842 = vrot.lane.b32.xlu1 %v1538_v11, %s1432_s27 }
 0x2c7   : > { %1008 = vrot.lane.b32.xlu1 %v1538_v11, %s1433_s28 }
 0x2cc   : > { %676 = vrot.lane.b32.xlu0 %v1538_v11, %s1434_s29 }
 0x2cf   : > { %v507_v58 = vpop.xlane.xlu1 %506 }
 0x2d0   : > { %1410 = vrcp.f32 %v507_v58 }
 0x2dd   : > { %v1411_v59 = vpop.eup %1410 }
 0x2de   : > { %v509_v60 = vmul.f32 %v1411_v59, %v1403_v40 }
 0x2e0   : > { %1339 = vmatmul.mubr.msk.f32.vlgmr.msra.gmra.mxu1 %vm421_vm2, %v509_v60 }
 0x2e1   : > { %1348 = vmatprep.mubr.msk.f32.mxu1 %vm1427_vm1, %v1426_v2 }
 0x337   : > { %v673_v61 = vpop.xlane.xlu0 %672 }
 0x338   : > { %1412 = vrcp.f32 %v673_v61 }
 0x33b   : > { %v839_v62 = vpop.xlane.xlu1 %838 }
 0x33c   : > { %1414 = vrcp.f32 %v839_v62 }
 0x33f   : > { %v1005_v63 = vpop.xlane.xlu0 %1004  ;;  %v843_v3 = vpop.permute.xlu1 %842 }
 0x340   : > { %1416 = vrcp.f32 %v1005_v63 }
 0x343   : > { %v677_v0 = vpop.permute.xlu0 %676  ;;  %v1009_v7 = vpop.permute.xlu1 %1008 }
 0x344   : > { %1347 = vmatpush3.msra.mxu1 %v677_v0 }
 0x345   : > { %v1413_v1 = vpop.eup %1412  ;;  %1356 = vmatprep.subr.mxu1 %v1426_v2 }
 0x346   : > { %v675_v4 = vmul.f32 %v1413_v1, %v1405_v52 }
 0x348   : > { %1349 = vmatmul.mubr.msk.f32.vlgmr.msra.gmra.mxu1 %vm421_vm2, %v675_v4 }
 0x349   : > { %v1415_v5 = vpop.eup %1414  ;;  %1357 = vmatpush3.msra.mxu1 %v843_v3  ;;  %1358 = vmatprep.mubr.msk.f32.mxu1 %vm1427_vm1, %v1426_v2 }
 0x34a   : > { %1366 = vmatprep.subr.mxu1 %v1426_v2  ;;  %v841_v6 = vmul.f32 %v1415_v5, %v1407_v54 }
 0x34c   : > { %1359 = vmatmul.mubr.msk.f32.vlgmr.msra.gmra.mxu1 %vm421_vm2, %v841_v6 }
 0x34d   : > { %v1417_v8 = vpop.eup %1416  ;;  %1367 = vmatpush3.msra.mxu1 %v1009_v7  ;;  %1368 = vmatprep.mubr.msk.f32.mxu1 %vm1427_vm1, %v1426_v2 }
 0x34e   : > { %v1007_v9 = vmul.f32 %v1417_v8, %v1409_v56 }
 0x350   : > { %1369 = vmatmul.mubr.msk.f32.vlgmr.msra.gmra.mxu1 %vm421_vm2, %v1007_v9 }
 0x3a0   : > { %v582_v11 = vpop.f32.mrf.mxu1 }
 0x3a2   : > { %v1340_v12 = vpop.f32.mrf.mxu1 }
 0x408   : > { %v748_v17 = vpop.f32.mrf.mxu1 }
 0x409   : > { %1085 = vrot.lane.b32.xlu0 %v748_v17, %s1435_s15 }
 0x40a   : > { %v1350_v18 = vpop.f32.mrf.mxu1 }
 0x40c   : > { %v914_v19 = vpop.f32.mrf.mxu1 }
 0x40d   : > { %1089 = vrot.lane.b32.xlu1 %v914_v19, %s1436_s16 }
 0x40e   : > { %v1360_v20 = vpop.f32.mrf.mxu1 }
 0x410   : > { %v1080_v21 = vpop.f32.mrf.mxu1 }
 0x411   : > { %1093 = vrot.lane.b32.xlu0 %v1080_v21, %s1437_s17 }
 0x412   : > { %v1370_v22 = vpop.f32.mrf.mxu1 }
 0x47b   : > { %v1086_v23 = vpop.permute.xlu0 %1085 }
 0x47c   : > { %v1096_v24 = vsel %vm421_vm2, %v582_v11, %v1086_v23 }
 0x47f   : > { %v1090_v2 = vpop.permute.xlu1 %1089 }
 0x480   : > { %v1098_v25 = vsel %vm1097_vm3, %v1096_v24, %v1090_v2 }
 0x483   : > { %v1094_v26 = vpop.permute.xlu0 %1093 }
 0x484   : > { %v1100_v27 = vsel %vm1099_vm4, %v1098_v25, %v1094_v26 }
 0x485   : > { %1380 = vmatmul.mubr.msk.f32.vlgmr.msra.gmra.mxu0 %vm270_vm0, %v1100_v27 }
 0x545   : > { %v1181_v29 = vpop.f32.mrf.mxu0 }
 0x546   : > { %v1182_v30 = vadd.f32 %v1274_v28, %v1181_v29 }
 0x547   : > { %v1381_v31 = vpop.f32.mrf.mxu0 }
 0x548   : > { %v1185_v32 = vadd.f32 %v1182_v30, %v1525_v10 }
 0x54a   : > { %1186 = vst.msk [vmem:[%s263_s23] sm:$0xff] %vm270_vm0, %v1185_v32 }
 0x54b PF: > { %s16_s21 = sadd.s32 1, %s1424_s21  }
 0x54c   : > { %p13_p4 = scmp.ge.s32.totalorder %s16_s21, 4  }
 0x54e   :  { %15 = sbr.rel (!%p13_p4) target bundleno = 1 (0x1), region = 77 }

// kernel: cross_block.5
= control target key start
LH: loop header
LB: loop body
LE: loop exit
PB: predicated region body
PF: predicated region fallthrough
CT: control target
= control target key end

     0   :  { %s1467_s24 = smov 0   ;;  %s1610_s0 = inlined_call_operand.vmem [shape: f32[2,8,32], index: 0, kind: input, shape index: {}]   ;;  %s1611_s1 = inlined_call_operand.vmem [shape: f32[1,32], index: 1, kind: input, shape index: {}]   ;;  %s1612_s2 = inlined_call_operand.vmem [shape: f32[1,32], index: 2, kind: input, shape index: {}]   ;;  %s1613_s3 = inlined_call_operand.vmem [shape: f32[32,96], index: 3, kind: input, shape index: {}]   ;;  %s1614_s4 = inlined_call_operand.vmem [shape: f32[32,32], index: 4, kind: input, shape index: {}]   ;;  %s1615_s5 = inlined_call_operand.vmem [shape: f32[1,32], index: 5, kind: input, shape index: {}]   ;;  %s1616_s6 = inlined_call_operand.vmem [shape: f32[2,8,32], index: 6, kind: output, shape index: {0}]   ;;  %s1617_s7 = inlined_call_operand.vmem [shape: f32[2,8,32], index: 7, kind: output, shape index: {1}]  }
   0x1 LB: > { %s1246_s25 = sadd.s32 4294967295, %s1409_s24   ;;  %p1250_p0 = scmp.ge.s32.totalorder %s1409_s24, 1  ;;  %s1409_s24 = sphi %s1467_s24, %s18_s24  }
   0x2   : > { %p239_p1 = scmp.lt.s32.totalorder %s1409_s24, 3 }
   0x4   : > { %p240_p2 = pnand %p1250_p0, %p239_p1 }
   0x5   : > { %p273_p3 = scmp.lt.s32.totalorder (!%p240_p2), %s1246_s25, 1  ;;  %s1413_s19 = smov (!%p240_p2), 64  }
   0x6   : > { %243 = sbr.rel (%p240_p2) target bundleno = 2167 (0x877), region = 44  ;;  %s1414_s20 = smov (!%p240_p2), 96  }
   0x7   : > { %s1415_s21 = smov (!%p240_p2), 88   ;;  %s1416_s22 = smov (!%p240_p2), 80  }
   0x8   : > { %s1417_s23 = smov (!%p240_p2), 120   ;;  %s1419_s27 = smov (!%p240_p2), 72  }
   0x9   : > { %s1420_s28 = smov (!%p240_p2), 104   ;;  %s1422_s30 = smov (!%p240_p2), 56  }
   0xa   : > { %s1423_s8 = smov (!%p240_p2), 40   ;;  %s1424_s17 = smov (!%p240_p2), 8  }
   0xb   : > { %s1619_s25 = smov (!%p273_p3, %s1246_s25), 1  ;;  %vm288_vm0 = vcmask 261120   ;;  %v320_v7 = vld [vmem:[%s1613_s3 + $0x18] sm:$0xff]  ;;  %v1411_v8 = vmov 0.0   ;;  %v319_v9 = vld [vmem:[%s1613_s3 + $0x10] sm:$0xff]  ;;  %vm1412_vm1 = vmmov 0  }
   0xc   : > { %s1475_s26 = sshll.u32 %s1619_s25, 3  ;;  %1299 = vmatprep.subr.mxu0 %v1411_v8  ;;  %1307 = vmatprep.mubr.msk.f32.mxu0 %vm1412_vm1, %v1411_v8  ;;  %v318_v10 = vld [vmem:[%s1613_s3 + $0x8] sm:$0xff]  ;;  %v317_v11 = vld [vmem:[%s1613_s3] sm:$0xff]  ;;  %vm397_vm2 = vcmask 64512   ;;  %s1418_s25 = smov 112   ;;  %vm1071_vm3 = vcmask 130048  }
   0xd   : > { %s276_s29 = scalar_lea.vmem %s1610_s0, %s1475_s26  ;;  %1300 = vmatpush3.msra.mxu0 %v320_v7  ;;  %1310 = vmatprep.subr.mxu1 %v1411_v8  ;;  %v1254_v16 = vld [vmem:[%s1611_s1] ss:$0 sm:$0xff]  ;;  %s1425_s18 = smov 16   ;;  %vm1073_vm4 = vcmask 195584  }
   0xe   : > { %v1481_v0 = vld [vmem:[%s276_s29] sm:$0xff]  ;;  %1301 = vmatprep.subr.mxu0 %v1411_v8  ;;  %1312 = vmatprep.mubr.msk.f32.mxu1 %vm1412_vm1, %v1411_v8  ;;  %s1421_s29 = smov 48  }
   0xf   : > { %v289_v1 = vsel %vm288_vm0, %v1481_v0, 0.0  ;;  %1302 = vmatpush3.msra.mxu0 %v319_v9  ;;  %v1255_v18 = vld [vmem:[%s1612_s2] ss:$0 sm:$0xff] }
  0x10   : > { %290 = vadd.xlane.f32.xlu0 %v289_v1  ;;  %1303 = vmatprep.subr.mxu0 %v1411_v8 }
  0x11   : > { %1304 = vmatpush3.msra.mxu0 %v318_v10 }
  0x12   : > { %1305 = vmatprep.subr.mxu0 %v1411_v8 }
  0x13   : > { %1306 = vmatpush3.msra.mxu0 %v317_v11 }
  0x14   : > { %1330 = vmatprep.subr.mxu0 %v1411_v8 }
  0x99   : > { %v291_v2 = vpop.xlane.xlu0 %290 }
  0x9a   : > { %v293_v3 = vmul.f32 0.03125, %v291_v2 }
  0x9c   : > { %v294_v4 = vsub.f32 %v1481_v0, %v293_v3 }
  0x9e   : > { %v295_v5 = vmul.f32 %v294_v4, %v294_v4 }
  0xa0   : > { %v296_v6 = vsel %vm288_vm0, %v295_v5, 0.0 }
  0xa1   : > { %297 = vadd.xlane.f32.xlu0 %v296_v6 }
 0x12a   : > { %v298_v12 = vpop.xlane.xlu0 %297 }
 0x12b   : > { %v299_v13 = vmul.f32 0.03125, %v298_v12 }
 0x12d   : > { %v300_v14 = vadd.f32 1e-05, %v299_v13 }
 0x12f   : > { %1385 = vrsqrt.f32 %v300_v14 }
 0x13c   : > { %v1386_v15 = vpop.eup %1385 }
 0x13d   : > { %v302_v17 = vmul.f32 %v1386_v15, %v294_v4 }
 0x13f   : > { %v309_v19 = vmul.f32 %v1254_v16, %v302_v17 }
 0x141   : > { %v316_v20 = vadd.f32 %v1255_v18, %v309_v19 }
 0x143   : > { %1308 = vmatmul.mubr.msk.f32.vlgmr.msra.gmra.mxu0 %vm288_vm0, %v316_v20 }
 0x144   : > { %1332 = vmatprep.mubr.msk.f32.mxu0 %vm1412_vm1, %v1411_v8 }
 0x203   : > { %v1518_v21 = vpop.f32.mrf.mxu0 }
 0x204   : > { %484 = vrot.lane.b32.xlu0 %v1518_v21, %s1413_s19  ;;  %395 = vrot.lane.b32.xlu1 %v1518_v21, %s1414_s20  ;;  %s1426_s19 = smov 24  }
 0x205   : > { %v1309_v22 = vpop.f32.mrf.mxu0 }
 0x206   : > { %v1078_v22 = vld [vmem:[%s1614_s4 + $0x18] sm:$0xff] }
 0x208   : > { %562 = vrot.lane.b32.xlu0 %v1518_v21, %s1415_s21 }
 0x276   : > { %v396_v23 = vpop.permute.xlu1 %395  ;;  %v485_v24 = vpop.permute.xlu0 %484 }
 0x277   : > { %1311 = vmatpush3.xpose.msk.msra.mxu1 %vm397_vm2, %v396_v23  ;;  %v1077_v23 = vld [vmem:[%s1614_s4 + $0x10] sm:$0xff] }
 0x278   : > { %1315 = vmatprep.subr.mxu1 %v1411_v8 }
 0x27a   : > { %1313 = vmatmul.mubr.msk.f32.vlgmr.msra.gmra.mxu1 %vm397_vm2, %v1518_v21  ;;  %v563_v35 = vpop.permute.xlu0 %562 }
 0x27b   : > { %1316 = vmatpush3.msra.mxu1 %v485_v24  ;;  %1317 = vmatprep.mubr.msk.f32.mxu1 %vm1412_vm1, %v1411_v8  ;;  %v1076_v24 = vld [vmem:[%s1614_s4 + $0x8] sm:$0xff] }
 0x27c   : > { %1320 = vmatprep.subr.mxu1 %v1411_v8 }
 0x33a   : > { %v468_v25 = vpop.f32.mrf.mxu1 }
 0x33b   : > { %v472_v26 = vmul.f32 0.35355338, %v468_v25  ;;  %v1075_v25 = vld [vmem:[%s1614_s4] sm:$0xff] }
 0x33c   : > { %v1314_v27 = vpop.f32.mrf.mxu1 }
 0x33d   : > { %v473_v28 = vsel %vm397_vm2, %v472_v26, -inf }
 0x33e   : > { %474 = vmax.xlane.f32.xlu1 %v473_v28 }
 0x34f   : > { %728 = vrot.lane.b32.xlu1 %v1518_v21, %s1416_s22 }
 0x3c7   : > { %v475_v29 = vpop.xlane.xlu1 %474 }
 0x3c8   : > { %v476_v30 = vsub.f32 %v472_v26, %v475_v29 }
 0x3ca   : > { %v477_v31 = vmul.f32 1.442695, %v476_v30 }
 0x3cb   : > { %v729_v32 = vpop.permute.xlu1 %728 }
 0x3cc   : > { %1387 = vpow2.f32 %v477_v31  ;;  %1331 = vmatpush3.xpose.msk.msra.mxu0 %vm397_vm2, %v729_v32 }
 0x3cd   : > { %1340 = vmatprep.subr.mxu0 %v1411_v8 }
 0x3d9   : > { %v1388_v33 = vpop.eup %1387 }
 0x3da   : > { %v479_v34 = vsel %vm397_vm2, %v1388_v33, 0.0 }
 0x3db   : > { %480 = vadd.xlane.f32.xlu0 %v479_v34 }
 0x3f1   : > { %560 = vrot.lane.b32.xlu0 %v1518_v21, %s1417_s23 }
 0x3f5   : > { %726 = vrot.lane.b32.xlu0 %v1518_v21, %s1418_s25  ;;  %s280_s25 = scalar_lea.vmem %s1616_s6, %s1475_s26 }
 0x3f9   : > { %894 = vrot.lane.b32.xlu0 %v1518_v21, %s1419_s27 }
 0x3fd   : > { %892 = vrot.lane.b32.xlu0 %v1518_v21, %s1420_s28 }
 0x464   : > { %v481_v36 = vpop.xlane.xlu0 %480 }
 0x465   : > { %1389 = vrcp.f32 %v481_v36 }
 0x468   : > { %v561_v37 = vpop.permute.xlu0 %560 }
 0x46c   : > { %v727_v38 = vpop.permute.xlu0 %726 }
 0x46d   : > { %1333 = vmatmul.mubr.msk.f32.vlgmr.msra.gmra.mxu0 %vm397_vm2, %v727_v38 }
 0x46e   : > { %1342 = vmatprep.mubr.msk.f32.mxu0 %vm1412_vm1, %v1411_v8 }
 0x470   : > { %v895_v39 = vpop.permute.xlu0 %894 }
 0x471   : > { %1341 = vmatpush3.xpose.msk.msra.mxu0 %vm397_vm2, %v895_v39 }
 0x472   : > { %v1390_v40 = vpop.eup %1389  ;;  %1350 = vmatprep.subr.mxu0 %v1411_v8 }
 0x473   : > { %v483_v41 = vmul.f32 %v1390_v40, %v1388_v33 }
 0x474   : > { %v893_v42 = vpop.permute.xlu0 %892 }
 0x475   : > { %1318 = vmatmul.mubr.msk.f32.vlgmr.msra.gmra.mxu1 %vm397_vm2, %v483_v41  ;;  %1343 = vmatmul.mubr.msk.f32.vlgmr.msra.gmra.mxu0 %vm397_vm2, %v893_v42 }
 0x476   : > { %1321 = vmatpush3.xpose.msk.msra.mxu1 %vm397_vm2, %v563_v35  ;;  %1322 = vmatprep.mubr.msk.f32.mxu1 %vm1412_vm1, %v1411_v8 }
 0x477   : > { %1325 = vmatprep.subr.mxu1 %v1411_v8  ;;  %1358 = vmatprep.mubr.msk.f32.mxu0 %vm1412_vm1, %v1411_v8 }
 0x478   : > { %1351 = vmatpush3.msra.mxu0 %v1078_v22 }
 0x479   : > { %1323 = vmatmul.mubr.msk.f32.vlgmr.msra.gmra.mxu1 %vm397_vm2, %v561_v37  ;;  %1352 = vmatprep.subr.mxu0 %v1411_v8  ;;  %v1269_v37 = vld [vmem:[%s1615_s5] ss:$0 sm:$0xff] }
 0x47a   : > { %1327 = vmatprep.mubr.msk.f32.mxu1 %vm1412_vm1, %v1411_v8  ;;  %1353 = vmatpush3.msra.mxu0 %v1077_v23 }
 0x47b   : > { %1354 = vmatprep.subr.mxu0 %v1411_v8 }
 0x47c   : > { %1355 = vmatpush3.msra.mxu0 %v1076_v24 }
 0x47d   : > { %1356 = vmatprep.subr.mxu0 %v1411_v8 }
 0x47e   : > { %1357 = vmatpush3.msra.mxu0 %v1075_v25 }
 0x52d   : > { %v800_v43 = vpop.f32.mrf.mxu0 }
 0x52e   : > { %v804_v44 = vmul.f32 0.35355338, %v800_v43 }
 0x52f   : > { %v1334_v45 = vpop.f32.mrf.mxu0 }
 0x530   : > { %v805_v46 = vsel %vm397_vm2, %v804_v44, -inf }
 0x531   : > { %806 = vmax.xlane.f32.xlu1 %v805_v46 }
 0x535   : > { %v1556_v47 = vpop.f32.mrf.mxu1  ;;  %v966_v48 = vpop.f32.mrf.mxu0 }
 0x536   : > { %v970_v54 = vmul.f32 0.35355338, %v966_v48 }
 0x537   : > { %v1319_v49 = vpop.f32.mrf.mxu1  ;;  %v1344_v50 = vpop.f32.mrf.mxu0 }
 0x538   : > { %v971_v56 = vsel %vm397_vm2, %v970_v54, -inf }
 0x539   : > { %v634_v51 = vpop.f32.mrf.mxu1 }
 0x53a   : > { %v638_v52 = vmul.f32 0.35355338, %v634_v51 }
 0x53b   : > { %v1324_v53 = vpop.f32.mrf.mxu1 }
 0x53c   : > { %v639_v55 = vsel %vm397_vm2, %v638_v52, -inf }
 0x53d   : > { %640 = vmax.xlane.f32.xlu0 %v639_v55 }
 0x541   : > { %972 = vmax.xlane.f32.xlu0 %v971_v56 }
 0x5ba   : > { %v807_v57 = vpop.xlane.xlu1 %806 }
 0x5bb   : > { %v808_v58 = vsub.f32 %v804_v44, %v807_v57 }
 0x5bd   : > { %v809_v59 = vmul.f32 1.442695, %v808_v58 }
 0x5bf   : > { %1391 = vpow2.f32 %v809_v59 }
 0x5c6   : > { %v641_v60 = vpop.xlane.xlu0 %640 }
 0x5c7   : > { %v642_v61 = vsub.f32 %v638_v52, %v641_v60 }
 0x5c9   : > { %v643_v62 = vmul.f32 1.442695, %v642_v61 }
 0x5ca   : > { %v973_v63 = vpop.xlane.xlu0 %972 }
 0x5cb   : > { %1393 = vpow2.f32 %v643_v62  ;;  %v974_v1 = vsub.f32 %v970_v54, %v973_v63 }
 0x5cc   : > { %v1392_v2 = vpop.eup %1391 }
 0x5cd   : > { %v975_v3 = vmul.f32 1.442695, %v974_v1  ;;  %v811_v4 = vsel %vm397_vm2, %v1392_v2, 0.0 }
 0x5ce   : > { %812 = vadd.xlane.f32.xlu0 %v811_v4 }
 0x5cf   : > { %1395 = vpow2.f32 %v975_v3 }
 0x5d8   : > { %v1394_v5 = vpop.eup %1393 }
 0x5d9   : > { %v645_v6 = vsel %vm397_vm2, %v1394_v5, 0.0 }
 0x5da   : > { %646 = vadd.xlane.f32.xlu0 %v645_v6 }
 0x5dc   : > { %v1396_v7 = vpop.eup %1395 }
 0x5dd   : > { %v977_v9 = vsel %vm397_vm2, %v1396_v7, 0.0 }
 0x5de   : > { %978 = vadd.xlane.f32.xlu1 %v977_v9 }
 0x5ef   : > { %816 = vrot.lane.b32.xlu1 %v1518_v21, %s1421_s29  ;;  %s284_s29 = scalar_lea.vmem %s1617_s7, %s1475_s26 }
 0x5f0   : > { %650 = vrot.lane.b32.xlu0 %v1518_v21, %s1422_s30 }
 0x5f3   : > { %982 = vrot.lane.b32.xlu1 %v1518_v21, %s1423_s8 }
 0x657   : > { %v813_v10 = vpop.xlane.xlu0 %812 }
 0x663   : > { %v647_v11 = vpop.xlane.xlu0 %646 }
 0x664   : > { %1397 = vrcp.f32 %v647_v11 }
 0x665   : > { %1399 = vrcp.f32 %v813_v10 }
 0x667   : > { %v979_v12 = vpop.xlane.xlu1 %978  ;;  %v651_v13 = vpop.permute.xlu0 %650 }
 0x668   : > { %1326 = vmatpush3.msra.mxu1 %v651_v13  ;;  %1401 = vrcp.f32 %v979_v12 }
 0x669   : > { %1335 = vmatprep.subr.mxu1 %v1411_v8 }
 0x66b   : > { %v817_v15 = vpop.permute.xlu1 %816 }
 0x66f   : > { %v983_v20 = vpop.permute.xlu1 %982 }
 0x671   : > { %v1398_v14 = vpop.eup %1397 }
 0x672   : > { %v649_v16 = vmul.f32 %v1398_v14, %v1394_v5  ;;  %v1400_v17 = vpop.eup %1399 }
 0x673   : > { %v815_v18 = vmul.f32 %v1400_v17, %v1392_v2 }
 0x674   : > { %1328 = vmatmul.mubr.msk.f32.vlgmr.msra.gmra.mxu1 %vm397_vm2, %v649_v16 }
 0x675   : > { %1336 = vmatpush3.msra.mxu1 %v817_v15  ;;  %1337 = vmatprep.mubr.msk.f32.mxu1 %vm1412_vm1, %v1411_v8  ;;  %v1402_v19 = vpop.eup %1401 }
 0x676   : > { %1345 = vmatprep.subr.mxu1 %v1411_v8  ;;  %v981_v21 = vmul.f32 %v1402_v19, %v1396_v7 }
 0x678   : > { %1338 = vmatmul.mubr.msk.f32.vlgmr.msra.gmra.mxu1 %vm397_vm2, %v815_v18 }
 0x679   : > { %1346 = vmatpush3.msra.mxu1 %v983_v20  ;;  %1347 = vmatprep.mubr.msk.f32.mxu1 %vm1412_vm1, %v1411_v8 }
 0x67c   : > { %1348 = vmatmul.mubr.msk.f32.vlgmr.msra.gmra.mxu1 %vm397_vm2, %v981_v21 }
 0x734   : > { %v722_v26 = vpop.f32.mrf.mxu1 }
 0x735   : > { %1059 = vrot.lane.b32.xlu1 %v722_v26, %s1424_s17 }
 0x736   : > { %v1329_v27 = vpop.f32.mrf.mxu1 }
 0x738   : > { %v888_v28 = vpop.f32.mrf.mxu1 }
 0x739   : > { %1063 = vrot.lane.b32.xlu0 %v888_v28, %s1425_s18 }
 0x73a   : > { %v1339_v29 = vpop.f32.mrf.mxu1 }
 0x73c   : > { %v1054_v30 = vpop.f32.mrf.mxu1 }
 0x73d   : > { %1067 = vrot.lane.b32.xlu1 %v1054_v30, %s1426_s19 }
 0x73e   : > { %v1349_v31 = vpop.f32.mrf.mxu1 }
 0x7a7   : > { %v1060_v8 = vpop.permute.xlu1 %1059 }
 0x7a8   : > { %v1070_v33 = vsel %vm397_vm2, %v1556_v47, %v1060_v8 }
 0x7ab   : > { %v1064_v32 = vpop.permute.xlu0 %1063 }
 0x7ac   : > { %v1072_v34 = vsel %vm1071_vm3, %v1070_v33, %v1064_v32 }
 0x7af   : > { %v1068_v35 = vpop.permute.xlu1 %1067 }
 0x7b0   : > { %v1074_v36 = vsel %vm1073_vm4, %v1072_v34, %v1068_v35 }
 0x7b1   : > { %1359 = vmatmul.mubr.msk.f32.vlgmr.msra.gmra.mxu0 %vm288_vm0, %v1074_v36 }
 0x871   : > { %v1155_v38 = vpop.f32.mrf.mxu0 }
 0x872   : > { %v1156_v39 = vadd.f32 %v1269_v37, %v1155_v38 }
 0x873   : > { %v1360_v40 = vpop.f32.mrf.mxu0 }
 0x874   : > { %1159 = vst.msk [vmem:[%s280_s25] sm:$0xff] %vm288_vm0, %v1156_v39  ;;  %v1160_v41 = vadd.f32 %v1156_v39, %v1481_v0 }
 0x876   : > { %1161 = vst.msk [vmem:[%s284_s29] sm:$0xff] %vm288_vm0, %v1160_v41 }
 0x877 PF: > { %s18_s24 = sadd.s32 1, %s1409_s24  }
 0x878   : > { %p15_p4 = scmp.ge.s32.totalorder %s18_s24, 4  }
 0x87a   :  { %17 = sbr.rel (!%p15_p4) target bundleno = 1 (0x1), region = 86 }

// kernel: cross_block.7
= control target key start
LH: loop header
LB: loop body
LE: loop exit
PB: predicated region body
PF: predicated region fallthrough
CT: control target
= control target key end

     0   :  { %11 = vsyncpa [#allocation3], 0  ;;  %s1703_s0 = inlined_call_operand.vmem [shape: f32[2,8,32], index: 0, kind: input, shape index: {}]   ;;  %s1704_s1 = inlined_call_operand.vmem [shape: f32[1,32], index: 1, kind: input, shape index: {}]   ;;  %s1705_s2 = inlined_call_operand.vmem [shape: f32[1,32], index: 2, kind: input, shape index: {}]   ;;  %s1706_s3 = inlined_call_operand.vmem [shape: f32[32,96], index: 3, kind: input, shape index: {}]   ;;  %s1707_s4 = inlined_call_operand.hbm [shape: f32[32,32], index: 4, kind: input, shape index: {}]   ;;  %s1708_s5 = inlined_call_operand.hbm [shape: f32[1,32], index: 5, kind: input, shape index: {}]   ;;  %s1709_s6 = inlined_call_operand.vmem [shape: f32[2,8,32], index: 6, kind: output, shape index: {}]  }
   0x1   :  { %12 = vsyncpa [#allocation5], 0  ;;  %s1532_s21 = smov 0  }
   0x2 LB: > { %s1538_s22 = sadd.s32 4294967295, %s1475_s21   ;;  %p1228_p0 = scmp.ge.s32.totalorder %s1475_s21, 1  ;;  %s1475_s21 = sphi %s1532_s21, %s18_s21  }
   0x3   : > { %p180_p1 = scmp.lt.s32.totalorder %s1475_s21, 3  ;;  %s1477_s23 = smov [#allocation2]  }
   0x4   : > { %s201_s24 = sshll.u32 %s1477_s23, 4  ;;  %p1359_p3 = scmp.eq.s32.totalorder %s1538_s22, 0  ;;  %s202_s24 = int_to_ptr.vmem [resolvable:$true] %s201_s24 }
   0x5   : > { %p1542_p2 = pnand %p1228_p0, %p180_p1  ;;  %s1478_s26 = smov [#allocation4]  }
   0x6   : > { %s215_s27 = sshll.u32 %s1478_s26, 4  ;;  %s1420_s29 = scalar_lea.vmem %s202_s24, 512  ;;  %s216_s27 = int_to_ptr.vmem [resolvable:$true] %s215_s27 }
   0x7   : > { %p1352_p4 = pneg %p1542_p2  ;;  %p1421_p7 = scmp.ne.s32.totalorder %s202_s24, %s1420_s29 }
   0x8   : > { %p1428_p10 = scmp.lt.s32.totalorder %s202_s24, %s202_s24  ;;  %p1429_p11 = scmp.lt.s32.totalorder %s1420_s29, %s1420_s29 }
   0x9   : > { %p1551_p5 = pnand %p1359_p3, %p1352_p4 }
   0xa   : > { %p1430_p12 = por %p1429_p11, %p1428_p10 }
   0xb   : > { %p1411_p6 = pneg %p1551_p5 }
   0xd   : > { %p1423_p8 = pnand %p1421_p7, %p1411_p6 }
   0xf   : > { %p1424_p9 = pneg %p1423_p8 }
  0x11   : > { %p1431_p13 = pnand %p1430_p12, %p1424_p9 }
  0x13   : > { %1434 = shalt.err (!%p1431_p13)
}
  0x14   : > { %s1479_s30 = smov 128   ;;  %s1480_s7 = smov 8  }
  0x15   : > { %1355 = dma.hbm_to_vmem [thread:$0]  (!%p1551_p5), %s1707_s4, 512, %s202_s24, [#allocation3], %s1479_s30, %s1479_s30, %s1480_s7  }
  0x16   : > { %s1446_s10 = scalar_lea.vmem %s216_s27, 16  ;;  %s1453_s11 = scalar_lea.vmem %s216_s27, 32 }
  0x17   : > { %p1447_p0 = scmp.ne.s32.totalorder %s216_s27, %s1446_s10  ;;  %p1454_p7 = scmp.lt.s32.totalorder %s216_s27, %s216_s27 }
  0x18   : > { %p1455_p8 = scmp.lt.s32.totalorder %s1453_s11, %s1446_s10 }
  0x19   : > { %p1449_p1 = pnand %p1447_p0, %p1411_p6 }
  0x1a   : > { %p1456_p9 = por %p1455_p8, %p1454_p7 }
  0x1b   : > { %p1450_p4 = pneg %p1449_p1 }
  0x1d   : > { %p1457_p10 = pnand %p1456_p9, %p1450_p4 }
  0x1f   : > { %1460 = shalt.err (!%p1457_p10)
}
  0x20   : > { %1358 = dma.hbm_to_vmem [thread:$0]  (!%p1551_p5), %s1708_s5, 16, %s216_s27, [#allocation5]  }
  0x21   : > { %235 = sbr.rel (%p1542_p2) target bundleno = 2199 (0x897), region = 44 }
  0x26   : > { %1466 = dma.done.wait (%p1359_p3), [#allocation3], 512  }
  0x27   : > { %1468 = vsyncadd (%p1359_p3), [#allocation3], 4294966784 }
  0x28   : > { %1470 = dma.done.wait (%p1359_p3), [#allocation5], 16  }
  0x29   : > { %1472 = vsyncadd (%p1359_p3), [#allocation5], 4294967280  ;;  %p267_p6 = scmp.lt.s32.totalorder %s1538_s22, 1  ;;  %vm278_vm0 = vcmask 261120   ;;  %v310_v7 = vld [vmem:[%s1706_s3 + $0x18] sm:$0xff]  ;;  %v1481_v8 = vmov 0.0  }
  0x2a   : > { %1282 = vmatprep.subr.mxu0 %v1481_v8  ;;  %v309_v9 = vld [vmem:[%s1706_s3 + $0x10] sm:$0xff]  ;;  %vm1482_vm1 = vmmov 0   ;;  %1293 = vmatprep.subr.mxu1 %v1481_v8  ;;  %v308_v10 = vld [vmem:[%s1706_s3 + $0x8] sm:$0xff]  ;;  %v307_v11 = vld [vmem:[%s1706_s3] sm:$0xff]  ;;  %s1483_s8 = smov 64   ;;  %s1484_s9 = smov 96  }
  0x2b   : > { %s1713_s22 = smov (!%p267_p6, %s1538_s22), 1  ;;  %1290 = vmatprep.mubr.msk.f32.mxu0 %vm1482_vm1, %v1481_v8  ;;  %1283 = vmatpush3.msra.mxu0 %v310_v7  ;;  %v1237_v16 = vld [vmem:[%s1704_s1] ss:$0 sm:$0xff]  ;;  %s1485_s10 = smov 88   ;;  %vm387_vm2 = vcmask 64512   ;;  %vm1061_vm3 = vcmask 130048  }
  0x2c   : > { %s1235_s14 = sshll.u32 %s1713_s22, 3  ;;  %1284 = vmatprep.subr.mxu0 %v1481_v8  ;;  %1295 = vmatprep.mubr.msk.f32.mxu1 %vm1482_vm1, %v1481_v8  ;;  %v1238_v18 = vld [vmem:[%s1705_s2] ss:$0 sm:$0xff]  ;;  %s1486_s11 = smov 80   ;;  %vm1063_vm4 = vcmask 195584  }
  0x2d   : > { %s270_s17 = scalar_lea.vmem %s1703_s0, %s1235_s14  ;;  %1285 = vmatpush3.msra.mxu0 %v309_v9  ;;  %s1487_s12 = smov 120  }
  0x2e   : > { %v1593_v0 = vld [vmem:[%s270_s17] sm:$0xff]  ;;  %1286 = vmatprep.subr.mxu0 %v1481_v8  ;;  %s1488_s13 = smov 112   ;;  %s1489_s15 = smov 72  }
  0x2f   : > { %v279_v1 = vsel %vm278_vm0, %v1593_v0, 0.0  ;;  %1287 = vmatpush3.msra.mxu0 %v308_v10  ;;  %s1490_s16 = smov 104   ;;  %s1491_s17 = smov 48  }
  0x30   : > { %280 = vadd.xlane.f32.xlu0 %v279_v1  ;;  %1288 = vmatprep.subr.mxu0 %v1481_v8  ;;  %s1492_s18 = smov 56   ;;  %s1493_s19 = smov 40  }
  0x31   : > { %1289 = vmatpush3.msra.mxu0 %v307_v11  ;;  %s1494_s20 = smov 8   ;;  %s1495_s23 = smov 16  }
  0x32   : > { %1313 = vmatprep.subr.mxu0 %v1481_v8  ;;  %s1496_s24 = smov 24   ;;  %s274_s27 = scalar_lea.vmem %s1709_s6, %s1235_s14 }
  0xb9   : > { %v281_v2 = vpop.xlane.xlu0 %280 }
  0xba   : > { %v283_v3 = vmul.f32 0.03125, %v281_v2 }
  0xbc   : > { %v284_v4 = vsub.f32 %v1593_v0, %v283_v3 }
  0xbe   : > { %v285_v5 = vmul.f32 %v284_v4, %v284_v4 }
  0xc0   : > { %v286_v6 = vsel %vm278_vm0, %v285_v5, 0.0 }
  0xc1   : > { %287 = vadd.xlane.f32.xlu0 %v286_v6 }
 0x14a   : > { %v288_v12 = vpop.xlane.xlu0 %287 }
 0x14b   : > { %v289_v13 = vmul.f32 0.03125, %v288_v12 }
 0x14d   : > { %v290_v14 = vadd.f32 1e-05, %v289_v13 }
 0x14f   : > { %1391 = vrsqrt.f32 %v290_v14 }
 0x15c   : > { %v1392_v15 = vpop.eup %1391 }
 0x15d   : > { %v292_v17 = vmul.f32 %v1392_v15, %v284_v4 }
 0x15f   : > { %v299_v19 = vmul.f32 %v1237_v16, %v292_v17 }
 0x161   : > { %v306_v20 = vadd.f32 %v1238_v18, %v299_v19 }
 0x163   : > { %1291 = vmatmul.mubr.msk.f32.vlgmr.msra.gmra.mxu0 %vm278_vm0, %v306_v20 }
 0x164   : > { %1315 = vmatprep.mubr.msk.f32.mxu0 %vm1482_vm1, %v1481_v8 }
 0x223   : > { %v1630_v21 = vpop.f32.mrf.mxu0 }
 0x224   : > { %474 = vrot.lane.b32.xlu0 %v1630_v21, %s1483_s8  ;;  %385 = vrot.lane.b32.xlu1 %v1630_v21, %s1484_s9 }
 0x225   : > { %v1292_v22 = vpop.f32.mrf.mxu0 }
 0x226   : > { %v1068_v22 = vld [vmem:[#allocation2 + $0x18] sm:$0xff] }
 0x228   : > { %552 = vrot.lane.b32.xlu0 %v1630_v21, %s1485_s10 }
 0x296   : > { %v386_v23 = vpop.permute.xlu1 %385  ;;  %v475_v24 = vpop.permute.xlu0 %474 }
 0x297   : > { %1294 = vmatpush3.xpose.msk.msra.mxu1 %vm387_vm2, %v386_v23  ;;  %v1067_v23 = vld [vmem:[#allocation2 + $0x10] sm:$0xff] }
 0x298   : > { %1298 = vmatprep.subr.mxu1 %v1481_v8 }
 0x29a   : > { %1296 = vmatmul.mubr.msk.f32.vlgmr.msra.gmra.mxu1 %vm387_vm2, %v1630_v21  ;;  %v553_v35 = vpop.permute.xlu0 %552 }
 0x29b   : > { %1299 = vmatpush3.msra.mxu1 %v475_v24  ;;  %1300 = vmatprep.mubr.msk.f32.mxu1 %vm1482_vm1, %v1481_v8  ;;  %v1066_v24 = vld [vmem:[#allocation2 + $0x8] sm:$0xff] }
 0x29c   : > { %1303 = vmatprep.subr.mxu1 %v1481_v8 }
 0x35a   : > { %v458_v25 = vpop.f32.mrf.mxu1 }
 0x35b   : > { %v462_v26 = vmul.f32 0.35355338, %v458_v25  ;;  %v1065_v25 = vld [vmem:[#allocation2] sm:$0xff] }
 0x35c   : > { %v1297_v27 = vpop.f32.mrf.mxu1 }
 0x35d   : > { %v463_v28 = vsel %vm387_vm2, %v462_v26, -inf }
 0x35e   : > { %464 = vmax.xlane.f32.xlu1 %v463_v28 }
 0x36f   : > { %718 = vrot.lane.b32.xlu1 %v1630_v21, %s1486_s11 }
 0x3e7   : > { %v465_v29 = vpop.xlane.xlu1 %464 }
 0x3e8   : > { %v466_v30 = vsub.f32 %v462_v26, %v465_v29 }
 0x3ea   : > { %v467_v31 = vmul.f32 1.442695, %v466_v30 }
 0x3eb   : > { %v719_v32 = vpop.permute.xlu1 %718 }
 0x3ec   : > { %1393 = vpow2.f32 %v467_v31  ;;  %1314 = vmatpush3.xpose.msk.msra.mxu0 %vm387_vm2, %v719_v32 }
 0x3ed   : > { %1323 = vmatprep.subr.mxu0 %v1481_v8 }
 0x3f9   : > { %v1394_v33 = vpop.eup %1393 }
 0x3fa   : > { %v469_v34 = vsel %vm387_vm2, %v1394_v33, 0.0 }
 0x3fb   : > { %470 = vadd.xlane.f32.xlu0 %v469_v34 }
 0x411   : > { %550 = vrot.lane.b32.xlu0 %v1630_v21, %s1487_s12 }
 0x415   : > { %716 = vrot.lane.b32.xlu0 %v1630_v21, %s1488_s13 }
 0x419   : > { %884 = vrot.lane.b32.xlu0 %v1630_v21, %s1489_s15 }
 0x41d   : > { %882 = vrot.lane.b32.xlu0 %v1630_v21, %s1490_s16 }
 0x484   : > { %v471_v36 = vpop.xlane.xlu0 %470 }
 0x485   : > { %1395 = vrcp.f32 %v471_v36 }
 0x488   : > { %v551_v37 = vpop.permute.xlu0 %550 }
 0x48c   : > { %v717_v38 = vpop.permute.xlu0 %716 }
 0x48d   : > { %1316 = vmatmul.mubr.msk.f32.vlgmr.msra.gmra.mxu0 %vm387_vm2, %v717_v38 }
 0x48e   : > { %1325 = vmatprep.mubr.msk.f32.mxu0 %vm1482_vm1, %v1481_v8 }
 0x490   : > { %v885_v39 = vpop.permute.xlu0 %884 }
 0x491   : > { %1324 = vmatpush3.xpose.msk.msra.mxu0 %vm387_vm2, %v885_v39 }
 0x492   : > { %v1396_v40 = vpop.eup %1395  ;;  %1333 = vmatprep.subr.mxu0 %v1481_v8 }
 0x493   : > { %v473_v41 = vmul.f32 %v1396_v40, %v1394_v33 }
 0x494   : > { %v883_v42 = vpop.permute.xlu0 %882 }
 0x495   : > { %1301 = vmatmul.mubr.msk.f32.vlgmr.msra.gmra.mxu1 %vm387_vm2, %v473_v41  ;;  %1326 = vmatmul.mubr.msk.f32.vlgmr.msra.gmra.mxu0 %vm387_vm2, %v883_v42 }
 0x496   : > { %1304 = vmatpush3.xpose.msk.msra.mxu1 %vm387_vm2, %v553_v35  ;;  %1305 = vmatprep.mubr.msk.f32.mxu1 %vm1482_vm1, %v1481_v8 }
 0x497   : > { %1308 = vmatprep.subr.mxu1 %v1481_v8  ;;  %1341 = vmatprep.mubr.msk.f32.mxu0 %vm1482_vm1, %v1481_v8 }
 0x498   : > { %1334 = vmatpush3.msra.mxu0 %v1068_v22 }
 0x499   : > { %1306 = vmatmul.mubr.msk.f32.vlgmr.msra.gmra.mxu1 %vm387_vm2, %v551_v37  ;;  %1335 = vmatprep.subr.mxu0 %v1481_v8  ;;  %v1252_v37 = vld [vmem:[#allocation4] ss:$0 sm:$0xff] }
 0x49a   : > { %1310 = vmatprep.mubr.msk.f32.mxu1 %vm1482_vm1, %v1481_v8  ;;  %1336 = vmatpush3.msra.mxu0 %v1067_v23 }
 0x49b   : > { %1337 = vmatprep.subr.mxu0 %v1481_v8 }
 0x49c   : > { %1338 = vmatpush3.msra.mxu0 %v1066_v24 }
 0x49d   : > { %1339 = vmatprep.subr.mxu0 %v1481_v8 }
 0x49e   : > { %1340 = vmatpush3.msra.mxu0 %v1065_v25 }
 0x54d   : > { %v790_v43 = vpop.f32.mrf.mxu0 }
 0x54e   : > { %v794_v44 = vmul.f32 0.35355338, %v790_v43 }
 0x54f   : > { %v1317_v45 = vpop.f32.mrf.mxu0 }
 0x550   : > { %v795_v46 = vsel %vm387_vm2, %v794_v44, -inf }
 0x551   : > { %796 = vmax.xlane.f32.xlu1 %v795_v46 }
 0x555   : > { %v1668_v47 = vpop.f32.mrf.mxu1  ;;  %v956_v48 = vpop.f32.mrf.mxu0 }
 0x556   : > { %v960_v54 = vmul.f32 0.35355338, %v956_v48 }
 0x557   : > { %v1302_v49 = vpop.f32.mrf.mxu1  ;;  %v1327_v50 = vpop.f32.mrf.mxu0 }
 0x558   : > { %v961_v56 = vsel %vm387_vm2, %v960_v54, -inf }
 0x559   : > { %v624_v51 = vpop.f32.mrf.mxu1 }
 0x55a   : > { %v628_v52 = vmul.f32 0.35355338, %v624_v51 }
 0x55b   : > { %v1307_v53 = vpop.f32.mrf.mxu1 }
 0x55c   : > { %v629_v55 = vsel %vm387_vm2, %v628_v52, -inf }
 0x55d   : > { %630 = vmax.xlane.f32.xlu0 %v629_v55 }
 0x561   : > { %962 = vmax.xlane.f32.xlu0 %v961_v56 }
 0x5da   : > { %v797_v57 = vpop.xlane.xlu1 %796 }
 0x5db   : > { %v798_v58 = vsub.f32 %v794_v44, %v797_v57 }
 0x5dd   : > { %v799_v59 = vmul.f32 1.442695, %v798_v58 }
 0x5df   : > { %1397 = vpow2.f32 %v799_v59 }
 0x5e6   : > { %v631_v60 = vpop.xlane.xlu0 %630 }
 0x5e7   : > { %v632_v61 = vsub.f32 %v628_v52, %v631_v60 }
 0x5e9   : > { %v633_v62 = vmul.f32 1.442695, %v632_v61 }
 0x5ea   : > { %v963_v63 = vpop.xlane.xlu0 %962 }
 0x5eb   : > { %1399 = vpow2.f32 %v633_v62  ;;  %v964_v1 = vsub.f32 %v960_v54, %v963_v63 }
 0x5ec   : > { %v1398_v2 = vpop.eup %1397 }
 0x5ed   : > { %v965_v3 = vmul.f32 1.442695, %v964_v1  ;;  %v801_v4 = vsel %vm387_vm2, %v1398_v2, 0.0 }
 0x5ee   : > { %802 = vadd.xlane.f32.xlu0 %v801_v4 }
 0x5ef   : > { %1401 = vpow2.f32 %v965_v3 }
 0x5f8   : > { %v1400_v5 = vpop.eup %1399 }
 0x5f9   : > { %v635_v6 = vsel %vm387_vm2, %v1400_v5, 0.0 }
 0x5fa   : > { %636 = vadd.xlane.f32.xlu0 %v635_v6 }
 0x5fc   : > { %v1402_v7 = vpop.eup %1401 }
 0x5fd   : > { %v967_v9 = vsel %vm387_vm2, %v1402_v7, 0.0 }
 0x5fe   : > { %968 = vadd.xlane.f32.xlu1 %v967_v9 }
 0x60f   : > { %806 = vrot.lane.b32.xlu1 %v1630_v21, %s1491_s17 }
 0x610   : > { %640 = vrot.lane.b32.xlu0 %v1630_v21, %s1492_s18 }
 0x613   : > { %972 = vrot.lane.b32.xlu1 %v1630_v21, %s1493_s19 }
 0x677   : > { %v803_v10 = vpop.xlane.xlu0 %802 }
 0x683   : > { %v637_v11 = vpop.xlane.xlu0 %636 }
 0x684   : > { %1403 = vrcp.f32 %v637_v11 }
 0x685   : > { %1405 = vrcp.f32 %v803_v10 }
 0x687   : > { %v969_v12 = vpop.xlane.xlu1 %968  ;;  %v641_v13 = vpop.permute.xlu0 %640 }
 0x688   : > { %1309 = vmatpush3.msra.mxu1 %v641_v13  ;;  %1407 = vrcp.f32 %v969_v12 }
 0x689   : > { %1318 = vmatprep.subr.mxu1 %v1481_v8 }
 0x68b   : > { %v807_v15 = vpop.permute.xlu1 %806 }
 0x68f   : > { %v973_v20 = vpop.permute.xlu1 %972 }
 0x691   : > { %v1404_v14 = vpop.eup %1403 }
 0x692   : > { %v639_v16 = vmul.f32 %v1404_v14, %v1400_v5  ;;  %v1406_v17 = vpop.eup %1405 }
 0x693   : > { %v805_v18 = vmul.f32 %v1406_v17, %v1398_v2 }
 0x694   : > { %1311 = vmatmul.mubr.msk.f32.vlgmr.msra.gmra.mxu1 %vm387_vm2, %v639_v16 }
 0x695   : > { %1319 = vmatpush3.msra.mxu1 %v807_v15  ;;  %1320 = vmatprep.mubr.msk.f32.mxu1 %vm1482_vm1, %v1481_v8  ;;  %v1408_v19 = vpop.eup %1407 }
 0x696   : > { %1328 = vmatprep.subr.mxu1 %v1481_v8  ;;  %v971_v21 = vmul.f32 %v1408_v19, %v1402_v7 }
 0x698   : > { %1321 = vmatmul.mubr.msk.f32.vlgmr.msra.gmra.mxu1 %vm387_vm2, %v805_v18 }
 0x699   : > { %1329 = vmatpush3.msra.mxu1 %v973_v20  ;;  %1330 = vmatprep.mubr.msk.f32.mxu1 %vm1482_vm1, %v1481_v8 }
 0x69c   : > { %1331 = vmatmul.mubr.msk.f32.vlgmr.msra.gmra.mxu1 %vm387_vm2, %v971_v21 }
 0x754   : > { %v712_v26 = vpop.f32.mrf.mxu1 }
 0x755   : > { %1049 = vrot.lane.b32.xlu1 %v712_v26, %s1494_s20 }
 0x756   : > { %v1312_v27 = vpop.f32.mrf.mxu1 }
 0x758   : > { %v878_v28 = vpop.f32.mrf.mxu1 }
 0x759   : > { %1053 = vrot.lane.b32.xlu0 %v878_v28, %s1495_s23 }
 0x75a   : > { %v1322_v29 = vpop.f32.mrf.mxu1 }
 0x75c   : > { %v1044_v30 = vpop.f32.mrf.mxu1 }
 0x75d   : > { %1057 = vrot.lane.b32.xlu1 %v1044_v30, %s1496_s24 }
 0x75e   : > { %v1332_v31 = vpop.f32.mrf.mxu1 }
 0x7c7   : > { %v1050_v32 = vpop.permute.xlu1 %1049 }
 0x7c8   : > { %v1060_v8 = vsel %vm387_vm2, %v1668_v47, %v1050_v32 }
 0x7cb   : > { %v1054_v33 = vpop.permute.xlu0 %1053 }
 0x7cc   : > { %v1062_v34 = vsel %vm1061_vm3, %v1060_v8, %v1054_v33 }
 0x7cf   : > { %v1058_v35 = vpop.permute.xlu1 %1057 }
 0x7d0   : > { %v1064_v36 = vsel %vm1063_vm4, %v1062_v34, %v1058_v35 }
 0x7d1   : > { %1342 = vmatmul.mubr.msk.f32.vlgmr.msra.gmra.mxu0 %vm278_vm0, %v1064_v36 }
 0x891   : > { %v1145_v38 = vpop.f32.mrf.mxu0 }
 0x892   : > { %v1146_v39 = vadd.f32 %v1252_v37, %v1145_v38 }
 0x893   : > { %v1343_v40 = vpop.f32.mrf.mxu0 }
 0x894   : > { %v1149_v41 = vadd.f32 %v1146_v39, %v1593_v0 }
 0x896   : > { %1150 = vst.msk [vmem:[%s274_s27] sm:$0xff] %vm278_vm0, %v1149_v41 }
 0x897 PF: > { %s18_s21 = sadd.s32 1, %s1475_s21  }
 0x898   : > { %p15_p2 = scmp.ge.s32.totalorder %s18_s21, 4  }
 0x89a   :  { %17 = sbr.rel (!%p15_p2) target bundleno = 2 (0x2), region = 83 }
 0x89f   :  { %1170 = vsyncpa [#allocation3], 1 }
 0x8a0   :  { %1172 = vsyncpa [#allocation3 + $0x1], 1 }
 0x8a1   :  { %1173 = vsyncpa [#allocation5], 1 }

// kernel: cross_block.6
= control target key start
LH: loop header
LB: loop body
LE: loop exit
PB: predicated region body
PF: predicated region fallthrough
CT: control target
= control target key end

     0   :  { %vm31_vm0 = vcmask 261120   ;;  %s630_s0 = inlined_call_operand.vmem [shape: f32[16,32], index: 0, kind: input, shape index: {}]   ;;  %s631_s1 = inlined_call_operand.vmem [shape: f32[1,32], index: 1, kind: input, shape index: {}]   ;;  %s632_s2 = inlined_call_operand.vmem [shape: f32[1,32], index: 2, kind: input, shape index: {}]   ;;  %s633_s3 = inlined_call_operand.vmem [shape: f32[32,128], index: 3, kind: input, shape index: {}]   ;;  %s634_s4 = inlined_call_operand.vmem [shape: f32[1,128], index: 4, kind: input, shape index: {}]   ;;  %s635_s5 = inlined_call_operand.vmem [shape: f32[128,32], index: 5, kind: input, shape index: {}]   ;;  %s636_s6 = inlined_call_operand.vmem [shape: f32[1,32], index: 6, kind: input, shape index: {}]   ;;  %s637_s7 = inlined_call_operand.hbm [shape: f32[16,32], index: 7, kind: output, shape index: {}]  }
   0x1   :  { %v518_v0 = vld [vmem:[%s630_s0] sm:$0xff]  ;;  %v523_v1 = vld [vmem:[%s630_s0 + $0x8] sm:$0xff] }
   0x2   :  { %12 = vsyncpa [#allocation3], 0  ;;  %v32_v2 = vsel %vm31_vm0, %v518_v0, 0.0  ;;  %v35_v3 = vsel %vm31_vm0, %v523_v1, 0.0  ;;  %v78_v14 = vld [vmem:[%s633_s3 + $0x18] sm:$0xff]  ;;  %v77_v15 = vld [vmem:[%s633_s3 + $0x10] sm:$0xff] }
   0x3   :  { %33 = vadd.xlane.f32.xlu0 %v32_v2  ;;  %389 = vmatprep.subr.mxu0 %v78_v14  ;;  %v76_v16 = vld [vmem:[%s633_s3 + $0x8] sm:$0xff]  ;;  %v75_v17 = vld [vmem:[%s633_s3] sm:$0xff]  ;;  %v256_v34 = vld [vmem:[%s635_s5 + $0x78] sm:$0xff]  ;;  %s472_s20 = smov [#allocation2]  }
   0x4   :  { %390 = vmatpush3.msra.mxu0 %v78_v14  ;;  %v359_v25 = vld [vmem:[%s631_s1] ss:$0 sm:$0xff]  ;;  %400 = vmatprep.subr.mxu1 %v256_v34  ;;  %v255_v35 = vld [vmem:[%s635_s5 + $0x70] sm:$0xff]  ;;  %v254_v36 = vld [vmem:[%s635_s5 + $0x68] sm:$0xff]  ;;  %s348_s21 = sshll.u32 %s472_s20, 4  ;;  %s349_s21 = int_to_ptr.vmem [resolvable:$true] %s348_s21 }
   0x5   :  { %391 = vmatprep.subr.mxu0 %v77_v15  ;;  %v360_v27 = vld [vmem:[%s632_s2] ss:$0 sm:$0xff]  ;;  %401 = vmatpush3.msra.mxu1 %v256_v34  ;;  %v252_v38 = vld [vmem:[%s635_s5 + $0x58] sm:$0xff]  ;;  %v251_v39 = vld [vmem:[%s635_s5 + $0x50] sm:$0xff]  ;;  %s450_s22 = scalar_lea.vmem %s349_s21, 256  ;;  %p455_p1 = scmp.lt.s32.totalorder %s349_s21, %s349_s21 }
   0x6   :  { %392 = vmatpush3.msra.mxu0 %v77_v15  ;;  %402 = vmatprep.subr.mxu1 %v255_v35  ;;  %v253_v37 = vld [vmem:[%s635_s5 + $0x60] sm:$0xff]  ;;  %v250_v40 = vld [vmem:[%s635_s5 + $0x48] sm:$0xff]  ;;  %v248_v42 = vld [vmem:[%s635_s5 + $0x38] sm:$0xff]  ;;  %p451_p0 = scmp.ne.s32.totalorder %s349_s21, %s450_s22  ;;  %p456_p2 = scmp.lt.s32.totalorder %s450_s22, %s450_s22 }
   0x7   :  { %36 = vadd.xlane.f32.xlu0 %v35_v3  ;;  %393 = vmatprep.subr.mxu0 %v76_v16  ;;  %v249_v41 = vld [vmem:[%s635_s5 + $0x40] sm:$0xff]  ;;  %v247_v43 = vld [vmem:[%s635_s5 + $0x30] sm:$0xff]  ;;  %v246_v44 = vld [vmem:[%s635_s5 + $0x28] sm:$0xff] }
   0x8   :  { %394 = vmatpush3.msra.mxu0 %v76_v16  ;;  %403 = vmatpush3.msra.mxu1 %v255_v35  ;;  %v245_v45 = vld [vmem:[%s635_s5 + $0x20] sm:$0xff]  ;;  %v244_v46 = vld [vmem:[%s635_s5 + $0x18] sm:$0xff]  ;;  %v243_v47 = vld [vmem:[%s635_s5 + $0x10] sm:$0xff]  ;;  %p457_p3 = por %p456_p2, %p455_p1 }
   0x9   :  { %395 = vmatprep.subr.mxu0 %v75_v17  ;;  %404 = vmatprep.subr.mxu1 %v254_v36  ;;  %v242_v48 = vld [vmem:[%s635_s5 + $0x8] sm:$0xff]  ;;  %v241_v49 = vld [vmem:[%s635_s5] sm:$0xff] }
   0xa   :  { %396 = vmatpush3.msra.mxu0 %v75_v17  ;;  %405 = vmatpush3.msra.mxu1 %v254_v36  ;;  %v361_v50 = vld [vmem:[%s634_s4] ss:$0 sm:$0xff]  ;;  %p458_p4 = pnand %p457_p3, %p451_p0 }
   0xb   :  { %406 = vmatprep.subr.mxu1 %v253_v37 }
   0xc   :  { %407 = vmatpush3.msra.mxu1 %v253_v37 }
   0xd   :  { %408 = vmatprep.subr.mxu1 %v252_v38 }
   0xe   :  { %409 = vmatpush3.msra.mxu1 %v252_v38 }
   0xf   :  { %410 = vmatprep.subr.mxu1 %v251_v39 }
  0x10   :  { %411 = vmatpush3.msra.mxu1 %v251_v39 }
  0x11   :  { %412 = vmatprep.subr.mxu1 %v250_v40 }
  0x12   :  { %413 = vmatpush3.msra.mxu1 %v250_v40 }
  0x13   :  { %414 = vmatprep.subr.mxu1 %v249_v41 }
  0x14   :  { %415 = vmatpush3.msra.mxu1 %v249_v41 }
  0x15   :  { %416 = vmatprep.subr.mxu1 %v248_v42 }
  0x16   :  { %417 = vmatpush3.msra.mxu1 %v248_v42 }
  0x17   :  { %418 = vmatprep.subr.mxu1 %v247_v43 }
  0x18   :  { %419 = vmatpush3.msra.mxu1 %v247_v43 }
  0x19   :  { %420 = vmatprep.subr.mxu1 %v246_v44 }
  0x1a   :  { %421 = vmatpush3.msra.mxu1 %v246_v44 }
  0x1b   :  { %422 = vmatprep.subr.mxu1 %v245_v45 }
  0x1c   :  { %423 = vmatpush3.msra.mxu1 %v245_v45 }
  0x1d   :  { %424 = vmatprep.subr.mxu1 %v244_v46 }
  0x1e   :  { %425 = vmatpush3.msra.mxu1 %v244_v46 }
  0x1f   :  { %426 = vmatprep.subr.mxu1 %v243_v47 }
  0x20   :  { %427 = vmatpush3.msra.mxu1 %v243_v47 }
  0x21   :  { %428 = vmatprep.subr.mxu1 %v242_v48 }
  0x22   :  { %429 = vmatpush3.msra.mxu1 %v242_v48 }
  0x23   :  { %430 = vmatprep.subr.mxu1 %v241_v49 }
  0x24   :  { %431 = vmatpush3.msra.mxu1 %v241_v49 }
  0x8c   :  { %v34_v4 = vpop.xlane.xlu0 %33 }
  0x8d   :  { %v39_v5 = vmul.f32 0.03125, %v34_v4 }
  0x8f   :  { %v41_v6 = vsub.f32 %v518_v0, %v39_v5 }
  0x90   :  { %v37_v7 = vpop.xlane.xlu0 %36 }
  0x91   :  { %v40_v8 = vmul.f32 0.03125, %v37_v7  ;;  %v43_v9 = vmul.f32 %v41_v6, %v41_v6 }
  0x93   :  { %v42_v10 = vsub.f32 %v523_v1, %v40_v8  ;;  %v45_v11 = vsel %vm31_vm0, %v43_v9, 0.0 }
  0x94   :  { %46 = vadd.xlane.f32.xlu1 %v45_v11 }
  0x95   :  { %v44_v12 = vmul.f32 %v42_v10, %v42_v10 }
  0x97   :  { %v48_v13 = vsel %vm31_vm0, %v44_v12, 0.0 }
  0x98   :  { %49 = vadd.xlane.f32.xlu1 %v48_v13 }
 0x11d   :  { %v47_v18 = vpop.xlane.xlu1 %46 }
 0x11e   :  { %v51_v19 = vmul.f32 0.03125, %v47_v18 }
 0x120   :  { %v53_v20 = vadd.f32 1e-05, %v51_v19 }
 0x121   :  { %v50_v21 = vpop.xlane.xlu1 %49 }
 0x122   :  { %438 = vrsqrt.f32 %v53_v20  ;;  %v52_v22 = vmul.f32 0.03125, %v50_v21 }
 0x124   :  { %v54_v23 = vadd.f32 1e-05, %v52_v22 }
 0x126   :  { %440 = vrsqrt.f32 %v54_v23 }
 0x12f   :  { %v439_v24 = vpop.eup %438 }
 0x130   :  { %v57_v26 = vmul.f32 %v439_v24, %v41_v6 }
 0x132   :  { %v65_v28 = vmul.f32 %v359_v25, %v57_v26 }
 0x133   :  { %v441_v29 = vpop.eup %440 }
 0x134   :  { %v58_v30 = vmul.f32 %v441_v29, %v42_v10  ;;  %v73_v31 = vadd.f32 %v360_v27, %v65_v28 }
 0x136   :  { %v66_v32 = vmul.f32 %v359_v25, %v58_v30  ;;  %397 = vmatprep.mubr.msk.f32.mxu0 %vm31_vm0, %v73_v31 }
 0x138   :  { %v74_v33 = vadd.f32 %v360_v27, %v66_v32 }
 0x13a   :  { %398 = vmatmul.mubr.msk.f32.vlgmr.msra.gmra.mxu0 %vm31_vm0, %v74_v33 }
 0x1fa   :  { %v399_v51 = vpop.f32.mrf.mxu0 }
 0x1fb   :  { %v604_v52 = vadd.f32 %v399_v51, %v361_v50 }
 0x1fc   :  { %v158_v53 = vpop.f32.mrf.mxu0 }
 0x1fd   :  { %v607_v54 = vmul.f32 0.70710677, %v604_v52  ;;  %v609_v55 = vadd.f32 %v361_v50, %v158_v53 }
 0x1ff   :  { %v172_v56 = vand.u32 2147483647, %v607_v54  ;;  %v613_v57 = vmul.f32 0.70710677, %v609_v55  ;;  %vm232_vm1 = vcmp.ge.f32.partialorder %v607_v54, 0.0 }
 0x201   :  { %v174_v58 = vmul.f32 0.5, %v172_v56  ;;  %v171_v59 = vand.u32 2147483647, %v613_v57  ;;  %v218_v33 = vsub.f32 0.0, %v172_v56  ;;  %vm231_vm2 = vcmp.ge.f32.partialorder %v613_v57, 0.0 }
 0x203   :  { %v176_v60 = vadd.f32 1.0, %v174_v58  ;;  %v173_v61 = vmul.f32 0.5, %v171_v59  ;;  %v217_v37 = vsub.f32 0.0, %v171_v59  ;;  %v220_v39 = vmul.f32 %v218_v33, %v172_v56 }
 0x205   :  { %442 = vrcp.f32 %v176_v60  ;;  %v175_v62 = vadd.f32 1.0, %v173_v61  ;;  %v219_v43 = vmul.f32 %v217_v37, %v171_v59  ;;  %v168_v61 = vmul.f32 0.5, %v604_v52 }
 0x207   :  { %444 = vrcp.f32 %v175_v62 }
 0x212   :  { %v443_v63 = vpop.eup %442 }
 0x213   :  { %v182_v2 = vmul.f32 0.17087276, %v443_v63 }
 0x214   :  { %v445_v3 = vpop.eup %444 }
 0x215   :  { %v184_v4 = vadd.f32 -0.82215226, %v182_v2  ;;  %v181_v5 = vmul.f32 0.17087276, %v445_v3  ;;  %v167_v2 = vmul.f32 0.5, %v609_v55 }
 0x217   :  { %v186_v6 = vmul.f32 %v443_v63, %v184_v4  ;;  %v183_v7 = vadd.f32 -0.82215226, %v181_v5 }
 0x219   :  { %v188_v8 = vadd.f32 1.4885159, %v186_v6  ;;  %v185_v9 = vmul.f32 %v445_v3, %v183_v7 }
 0x21b   :  { %v190_v10 = vmul.f32 %v443_v63, %v188_v8  ;;  %v187_v11 = vadd.f32 1.4885159, %v185_v9 }
 0x21d   :  { %v192_v12 = vadd.f32 -1.135204, %v190_v10  ;;  %v189_v13 = vmul.f32 %v445_v3, %v187_v11 }
 0x21f   :  { %v194_v14 = vmul.f32 %v443_v63, %v192_v12  ;;  %v191_v15 = vadd.f32 -1.135204, %v189_v13 }
 0x221   :  { %v196_v16 = vadd.f32 0.27886808, %v194_v14  ;;  %v193_v17 = vmul.f32 %v445_v3, %v191_v15 }
 0x223   :  { %v198_v18 = vmul.f32 %v443_v63, %v196_v16  ;;  %v195_v19 = vadd.f32 0.27886808, %v193_v17 }
 0x225   :  { %v200_v20 = vadd.f32 -0.18628806, %v198_v18  ;;  %v197_v21 = vmul.f32 %v445_v3, %v195_v19 }
 0x227   :  { %v202_v22 = vmul.f32 %v443_v63, %v200_v20  ;;  %v199_v23 = vadd.f32 -0.18628806, %v197_v21 }
 0x229   :  { %v204_v24 = vadd.f32 0.09678418, %v202_v22  ;;  %v201_v25 = vmul.f32 %v445_v3, %v199_v23 }
 0x22b   :  { %v206_v26 = vmul.f32 %v443_v63, %v204_v24  ;;  %v203_v27 = vadd.f32 0.09678418, %v201_v25 }
 0x22d   :  { %v208_v28 = vadd.f32 0.37409195, %v206_v26  ;;  %v205_v29 = vmul.f32 %v445_v3, %v203_v27 }
 0x22f   :  { %v210_v30 = vmul.f32 %v443_v63, %v208_v28  ;;  %v207_v31 = vadd.f32 0.37409195, %v205_v29 }
 0x231   :  { %v212_v32 = vadd.f32 1.0000237, %v210_v30  ;;  %v209_v34 = vmul.f32 %v445_v3, %v207_v31 }
 0x233   :  { %v214_v35 = vmul.f32 %v443_v63, %v212_v32  ;;  %v211_v36 = vadd.f32 1.0000237, %v209_v34 }
 0x235   :  { %v216_v38 = vadd.f32 -1.2655122, %v214_v35  ;;  %v213_v40 = vmul.f32 %v445_v3, %v211_v36 }
 0x237   :  { %v222_v41 = vadd.f32 %v220_v39, %v216_v38  ;;  %v215_v42 = vadd.f32 -1.2655122, %v213_v40 }
 0x239   :  { %v225_v44 = vmul.f32 1.442695, %v222_v41  ;;  %v221_v45 = vadd.f32 %v219_v43, %v215_v42 }
 0x23b   :  { %446 = vpow2.f32 %v225_v44  ;;  %v223_v46 = vmul.f32 1.442695, %v221_v45 }
 0x23d   :  { %448 = vpow2.f32 %v223_v46 }
 0x248   :  { %v447_v47 = vpop.eup %446 }
 0x249   :  { %v228_v48 = vmul.f32 %v447_v47, %v443_v63 }
 0x24a   :  { %v449_v49 = vpop.eup %448 }
 0x24b   :  { %v227_v50 = vmul.f32 %v449_v49, %v445_v3  ;;  %v230_v51 = vsub.f32 1.0, %v228_v48  ;;  %v364_v3 = vld [vmem:[%s636_s6] ss:$0 sm:$0xff] }
 0x24d   :  { %v229_v53 = vsub.f32 1.0, %v227_v50  ;;  %v234_v58 = vsub.f32 0.0, %v230_v51 }
 0x24f   :  { %v233_v60 = vsub.f32 0.0, %v229_v53  ;;  %v236_v56 = vsel %vm232_vm1, %v230_v51, %v234_v58 }
 0x250   :  { %v238_v59 = vadd.f32 1.0, %v236_v56 }
 0x251   :  { %v235_v62 = vsel %vm231_vm2, %v229_v53, %v233_v60 }
 0x252   :  { %v237_v4 = vadd.f32 1.0, %v235_v62  ;;  %v240_v5 = vmul.f32 %v238_v59, %v168_v61 }
 0x254   :  { %v239_v63 = vmul.f32 %v237_v4, %v167_v2 }
 0x256   :  { %432 = vmatprep.mubr.f32.mxu1 %v239_v63 }
 0x257   :  { %433 = vmatmul.mubr.f32.vlgmr.msra.gmra.mxu1 %v240_v5 }
 0x317   :  { %v434_v54 = vpop.f32.mrf.mxu1 }
 0x318   :  { %v336_v6 = vadd.f32 %v434_v54, %v364_v3 }
 0x319   :  { %v330_v52 = vpop.f32.mrf.mxu1 }
 0x31a   :  { %v340_v57 = vadd.f32 %v336_v6, %v523_v1  ;;  %v331_v7 = vadd.f32 %v364_v3, %v330_v52 }
 0x31c   :  { %342 = vst.msk [vmem:[#allocation2 + $0x8] sm:$0xff] %vm31_vm0, %v340_v57  ;;  %v339_v55 = vadd.f32 %v331_v7, %v518_v0 }
 0x31e   :  { %341 = vst.msk [vmem:[#allocation2] sm:$0xff] %vm31_vm0, %v339_v55 }
 0x31f   :  { %461 = shalt.err (!%p458_p4)
}
 0x320   :  { %s473_s6 = smov 128   ;;  %s474_s23 = smov 8  }
 0x321   :  { %354 = dma.vmem_to_hbm [thread:$0]  %s349_s21, 256, %s637_s7, [#allocation3], %s473_s6, %s473_s6, %s474_s23  }
 0x322   :  { %470 = dma.done.wait [#allocation3], 256  }
 0x323   :  { %471 = vsyncadd [#allocation3], 4294967040 }
 0x324   :  { %358 = vsyncpa [#allocation3], 1 }

</bundles_post_ra>
